<compile_context>
chip_gen: v7x
topology: tpu7x:2x2x1
jax: 0.10.0
libtpu: 0.0.40
codegen_flags: <defaults>
</compile_context>

<pallas_src>
import jax
import jax.numpy as jnp
from jax import lax
from jax.experimental import pallas as pl
from jax.experimental.pallas import tpu as pltpu


def bottleneck_kernel(x_ref, w1_ref, b1_ref, w2_ref, b2_ref,
                      w3_ref, b3_ref, out_ref, pad_ref):
    B, H, W, Cin = x_ref.shape
    width = w1_ref.shape[1]
    Cout = w3_ref.shape[1]
    W_pad = pad_ref.shape[2]
    M = B * H * W

    x = x_ref[...]                                  # (B,H,W,Cin) f32 (residual)
    x2d = x.reshape(M, Cin)                         # leading-dim collapse only

    # --- conv1 (1x1, BN scale pre-folded) + bias + ReLU ----------------------
    out1 = jnp.dot(x2d.astype(jnp.bfloat16), w1_ref[...],
                   preferred_element_type=jnp.float32)
    out1 = jnp.maximum(out1 + b1_ref[...], 0.0)     # (M, width) f32

    # --- conv2 (3x3, stride=1, pad=1) + bias + ReLU --------------------------
    # Zero only the 1-wide halo the taps actually read (cheap, and correct
    # even when the parallel grid axis is sharded across TensorCores), then
    # write the interior.
    zrow = jnp.zeros((B, 1, W_pad, width), jnp.float32)
    pad_ref[:, 0:1, :, :] = zrow
    pad_ref[:, H + 1:H + 2, :, :] = zrow
    zcol = jnp.zeros((B, H + 2, 1, width), jnp.float32)
    pad_ref[:, :, 0:1, :] = zcol
    pad_ref[:, :, W + 1:W + 2, :] = zcol
    pad_ref[:, 1:H + 1, 1:W + 1, :] = out1.reshape(B, H, W, width)

    # im2col: concatenate the 9 (kh, kw) taps along channels (matches the
    # HWIO row ordering of w2_ref) and contract in ONE K = 9*width matmul.
    taps = [pad_ref[:, kh:kh + H, kw:kw + W, :]
            for kh in range(3) for kw in range(3)]
    cols = jnp.concatenate(taps, axis=-1)                    # (B,H,W,9*width)
    cols = cols.reshape(M, 9 * width).astype(jnp.bfloat16)
    out2 = jnp.dot(cols, w2_ref[...],
                   preferred_element_type=jnp.float32)
    out2 = jnp.maximum(out2 + b2_ref[...], 0.0)     # (M, width) f32

    # --- conv3 (1x1) + bias ---------------------------------------------------
    out3 = jnp.dot(out2.astype(jnp.bfloat16), w3_ref[...],
                   preferred_element_type=jnp.float32)
    out3 = out3 + b3_ref[...]

    # --- residual add (identity, downsample=None) + ReLU ----------------------
    out_ref[...] = jnp.maximum(out3 + x2d, 0.0).reshape(B, H, W, Cout)


def bottleneck_pallas(x_nhwc, params, block_n=None):
    """x_nhwc: (N, H, W, Cin) float32. params from prepare_inference_params."""
    w1, b1, w2_hwio, b2, w3, b3 = params
    N, H, W, Cin = x_nhwc.shape
    width = w1.shape[1]
    Cout = w3.shape[1]
    # Kernel assumes stride=1 and identity residual (downsample=None).
    assert Cin == Cout, "identity residual requires Cin == Cout"

    if block_n is None:
        block_n = min(N, max(1, 128 // (H * W)))    # target matmul M >= 128
        while N % block_n:
            block_n -= 1
    assert N % block_n == 0

    w2_mat = w2_hwio.reshape(9 * width, width)      # (kh*kw*cin, cout), HWIO order
    b1_2d = b1.reshape(1, width).astype(jnp.float32)
    b2_2d = b2.reshape(1, width).astype(jnp.float32)
    b3_2d = b3.reshape(1, Cout).astype(jnp.float32)

    W_scr = ((W + 2 + 7) // 8) * 8                  # pad scratch W to 8 sublanes

    full = lambda shape: pl.BlockSpec(shape, lambda n: (0,) * len(shape))

    return pl.pallas_call(
        bottleneck_kernel,
        out_shape=jax.ShapeDtypeStruct((N, H, W, Cout), jnp.float32),
        grid_spec=pltpu.PrefetchScalarGridSpec(
            num_scalar_prefetch=0,
            grid=(N // block_n,),
            in_specs=[
                pl.BlockSpec((block_n, H, W, Cin), lambda n: (n, 0, 0, 0)),  # x
                full((Cin, width)),                                          # w1
                full((1, width)),                                            # b1
                full((9 * width, width)),                                    # w2
                full((1, width)),                                            # b2
                full((width, Cout)),                                         # w3
                full((1, Cout)),                                             # b3
            ],
            out_specs=pl.BlockSpec((block_n, H, W, Cout),
                                   lambda n: (n, 0, 0, 0)),
            scratch_shapes=[pltpu.VMEM((block_n, H + 2, W_scr, width),
                                       jnp.float32)],
        ),
        compiler_params=pltpu.CompilerParams(
            dimension_semantics=("parallel",),
            vmem_limit_bytes=32 * 1024 * 1024),
    )(x_nhwc, w1, b1_2d, w2_mat, b2_2d, w3, b3_2d)


def fold_bn_into_conv(w, gamma, beta, mean, var, eps=1e-5):
    """Fold inference-mode BN into the conv's output-channel axis."""
    scale = gamma / jnp.sqrt(var + eps)
    bias = beta - mean * scale
    return w * scale, bias                          # scale broadcasts on last axis


def make_params(key, inplanes, planes, base_width=64, groups=1):
    """Deterministic synthetic weights matching Bottleneck(__init__) shapes."""
    width = int(planes * (base_width / 64.0)) * groups
    cout = planes * 4                               # expansion = 4
    keys = jax.random.split(key, 6)

    w1 = 0.1 * jax.random.normal(keys[0], (inplanes, width), jnp.float32)
    w2 = 0.1 * jax.random.normal(keys[1], (3, 3, width, width), jnp.float32)
    w3 = 0.1 * jax.random.normal(keys[2], (width, cout), jnp.float32)

    def bn(k, c):
        kg, kb, km, kv = jax.random.split(k, 4)
        gamma = 1.0 + 0.1 * jax.random.normal(kg, (c,), jnp.float32)
        beta = 0.1 * jax.random.normal(kb, (c,), jnp.float32)
        mean = 0.1 * jax.random.normal(km, (c,), jnp.float32)
        var = jax.random.uniform(kv, (c,), jnp.float32, 0.5, 1.5)
        return gamma, beta, mean, var

    return (w1, bn(keys[3], width), w2, bn(keys[4], width), w3, bn(keys[5], cout))


def prepare_inference_params(raw):
    """Fold BN into the conv weights; cast matmul weights to bf16."""
    w1, bn1, w2, bn2, w3, bn3 = raw
    w1f, b1 = fold_bn_into_conv(w1, *bn1)
    w2f, b2 = fold_bn_into_conv(w2, *bn2)
    w3f, b3 = fold_bn_into_conv(w3, *bn3)
    return (w1f.astype(jnp.bfloat16), b1,
            w2f.astype(jnp.bfloat16), b2,
            w3f.astype(jnp.bfloat16), b3)


def bottleneck_reference(x_nhwc, params):
    """Plain-JAX reference with the same bf16-matmul / f32-accumulate math."""
    w1, b1, w2_hwio, b2, w3, b3 = params
    out = jnp.einsum('nhwc,cd->nhwd', x_nhwc.astype(jnp.bfloat16), w1,
                     preferred_element_type=jnp.float32)
    out = jnp.maximum(out + b1, 0.0)
    out = lax.conv_general_dilated(out.astype(jnp.bfloat16), w2_hwio,
                                   window_strides=(1, 1),
                                   padding=((1, 1), (1, 1)),
                                   dimension_numbers=('NHWC', 'HWIO', 'NHWC'),
                                   preferred_element_type=jnp.float32)
    out = jnp.maximum(out + b2, 0.0)
    out = jnp.einsum('nhwc,cd->nhwd', out.astype(jnp.bfloat16), w3,
                     preferred_element_type=jnp.float32)
    out = out + b3
    return jnp.maximum(out + x_nhwc, 0.0)


if __name__ == "__main__":
    # Bottleneck(inplanes=16, planes=4): width=4, out channels = 16,
    # stride=1, downsample=None (identity residual valid since 16 == 16).
    N, Cin, H, W = 4, 16, 8, 8
    planes = 4

    key = jax.random.PRNGKey(0)
    kx, kp = jax.random.split(key)
    x_nchw = jax.random.normal(kx, (N, Cin, H, W), jnp.float32)  # PyTorch layout
    raw = make_params(kp, Cin, planes)
    params = prepare_inference_params(raw)

    x_nhwc = jnp.transpose(x_nchw, (0, 2, 3, 1))
    out_nhwc = bottleneck_pallas(x_nhwc, params, block_n=2)   # M = 2*8*8 = 128
    out_nhwc = jax.block_until_ready(out_nhwc)
    out_nchw = jnp.transpose(out_nhwc, (0, 3, 1, 2))          # back to NCHW

    ref = bottleneck_reference(x_nhwc, params)
    assert out_nhwc.shape == (N, H, W, Cin)
    max_err = float(jnp.max(jnp.abs(out_nhwc - ref)))
    assert jnp.allclose(out_nhwc, ref, atol=2e-3, rtol=2e-3), \
        f"mismatch vs reference, max abs err {max_err}"

    # TODO(synk): BatchNorm implemented in inference mode (folded running
    # stats); training-mode batch statistics are not computed in-kernel.
    print("KERNEL_OK")
</pallas_src>

<mosaic_0001>
module attributes {stable_mosaic.version = 11 : i64} {
  func.func @bottleneck_kernel(%arg0: i32, %arg1: memref<2x8x8x16xf32, #tpu.memory_space<vmem>>, %arg2: memref<16x4xbf16, #tpu.memory_space<vmem>>, %arg3: memref<1x4xf32, #tpu.memory_space<vmem>>, %arg4: memref<36x4xbf16, #tpu.memory_space<vmem>>, %arg5: memref<1x4xf32, #tpu.memory_space<vmem>>, %arg6: memref<4x16xbf16, #tpu.memory_space<vmem>>, %arg7: memref<1x16xf32, #tpu.memory_space<vmem>>, %arg8: memref<2x8x8x16xf32, #tpu.memory_space<vmem>>, %arg9: memref<2x10x16x4xf32, #tpu.memory_space<vmem>>) attributes {dimension_semantics = [#tpu.dimension_semantics<parallel>], iteration_bounds = array<i64: 2>, scalar_prefetch = 0 : i64, scratch_operands = 1 : i64, tpu.core_type = #tpu.core_type<tc>, window_params = [{transform_indices = @transform_0, window_bounds = array<i64: 2, 8, 8, 16>}, {pipeline_mode = #tpu.pipeline_mode<synchronous>, transform_indices = @transform_1, window_bounds = array<i64: 16, 4>}, {pipeline_mode = #tpu.pipeline_mode<synchronous>, transform_indices = @transform_2, window_bounds = array<i64: 1, 4>}, {pipeline_mode = #tpu.pipeline_mode<synchronous>, transform_indices = @transform_3, window_bounds = array<i64: 36, 4>}, {pipeline_mode = #tpu.pipeline_mode<synchronous>, transform_indices = @transform_4, window_bounds = array<i64: 1, 4>}, {pipeline_mode = #tpu.pipeline_mode<synchronous>, transform_indices = @transform_5, window_bounds = array<i64: 4, 16>}, {pipeline_mode = #tpu.pipeline_mode<synchronous>, transform_indices = @transform_6, window_bounds = array<i64: 1, 16>}, {transform_indices = @transform_7, window_bounds = array<i64: 2, 8, 8, 16>}]} {
    %c0 = arith.constant 0 : index
    %c0_0 = arith.constant 0 : index
    %c0_1 = arith.constant 0 : index
    %c0_2 = arith.constant 0 : index
    %0 = vector.load %arg1[%c0, %c0_0, %c0_1, %c0_2] : memref<2x8x8x16xf32, #tpu.memory_space<vmem>>, vector<2x8x8x16xf32>
    %1 = vector.shape_cast %0 : vector<2x8x8x16xf32> to vector<128x16xf32>
    %2 = arith.truncf %1 : vector<128x16xf32> to vector<128x16xbf16>
    %c0_3 = arith.constant 0 : index
    %c0_4 = arith.constant 0 : index
    %3 = vector.load %arg2[%c0_3, %c0_4] : memref<16x4xbf16, #tpu.memory_space<vmem>>, vector<16x4xbf16>
    %cst = arith.constant dense<0.000000e+00> : vector<128x4xf32>
    %4 = tpu.matmul %2, %3, %cst {dimension_numbers = #tpu.dot_dimension_numbers<[1], [0], [0], [1], [0, 0, 1, 1], [], []>} : vector<128x16xbf16>, vector<16x4xbf16>, vector<128x4xf32> -> vector<128x4xf32>
    %c0_5 = arith.constant 0 : index
    %c0_6 = arith.constant 0 : index
    %5 = vector.load %arg3[%c0_5, %c0_6] : memref<1x4xf32, #tpu.memory_space<vmem>>, vector<1x4xf32>
    %6 = vector.broadcast %5 : vector<1x4xf32> to vector<128x4xf32>
    %7 = arith.addf %4, %6 : vector<128x4xf32>
    %cst_7 = arith.constant 0.000000e+00 : f32
    %8 = vector.broadcast %cst_7 : f32 to vector<128x4xf32>
    %9 = arith.maximumf %7, %8 : vector<128x4xf32>
    %cst_8 = arith.constant 0.000000e+00 : f32
    %10 = vector.broadcast %cst_8 : f32 to vector<2x1x16x4xf32>
    %c0_9 = arith.constant 0 : index
    %c0_10 = arith.constant 0 : index
    %c0_11 = arith.constant 0 : index
    %c0_12 = arith.constant 0 : index
    %11 = vector.load %arg9[%c0_9, %c0_10, %c0_11, %c0_12] : memref<2x10x16x4xf32, #tpu.memory_space<vmem>>, vector<2x1x16x4xf32>
    tpu.vector_store %arg9[%c0_9, %c0_10, %c0_11, %c0_12], %10 {strides = array<i32>} : memref<2x10x16x4xf32, #tpu.memory_space<vmem>>, vector<2x1x16x4xf32>,
    %c0_13 = arith.constant 0 : index
    %c9 = arith.constant 9 : index
    %c0_14 = arith.constant 0 : index
    %c0_15 = arith.constant 0 : index
    %12 = vector.load %arg9[%c0_13, %c9, %c0_14, %c0_15] : memref<2x10x16x4xf32, #tpu.memory_space<vmem>>, vector<2x1x16x4xf32>
    tpu.vector_store %arg9[%c0_13, %c9, %c0_14, %c0_15], %10 {strides = array<i32>} : memref<2x10x16x4xf32, #tpu.memory_space<vmem>>, vector<2x1x16x4xf32>,
    %cst_16 = arith.constant 0.000000e+00 : f32
    %13 = vector.broadcast %cst_16 : f32 to vector<2x10x1x4xf32>
    %c0_17 = arith.constant 0 : index
    %c0_18 = arith.constant 0 : index
    %c0_19 = arith.constant 0 : index
    %c0_20 = arith.constant 0 : index
    %14 = vector.load %arg9[%c0_17, %c0_18, %c0_19, %c0_20] : memref<2x10x16x4xf32, #tpu.memory_space<vmem>>, vector<2x10x1x4xf32>
    tpu.vector_store %arg9[%c0_17, %c0_18, %c0_19, %c0_20], %13 {strides = array<i32>} : memref<2x10x16x4xf32, #tpu.memory_space<vmem>>, vector<2x10x1x4xf32>,
    %c0_21 = arith.constant 0 : index
    %c0_22 = arith.constant 0 : index
    %c9_23 = arith.constant 9 : index
    %c0_24 = arith.constant 0 : index
    %15 = vector.load %arg9[%c0_21, %c0_22, %c9_23, %c0_24] : memref<2x10x16x4xf32, #tpu.memory_space<vmem>>, vector<2x10x1x4xf32>
    tpu.vector_store %arg9[%c0_21, %c0_22, %c9_23, %c0_24], %13 {strides = array<i32>} : memref<2x10x16x4xf32, #tpu.memory_space<vmem>>, vector<2x10x1x4xf32>,
    %16 = vector.shape_cast %9 : vector<128x4xf32> to vector<2x8x8x4xf32>
    %c0_25 = arith.constant 0 : index
    %c1 = arith.constant 1 : index
    %c1_26 = arith.constant 1 : index
    %c0_27 = arith.constant 0 : index
    %17 = vector.load %arg9[%c0_25, %c1, %c1_26, %c0_27] : memref<2x10x16x4xf32, #tpu.memory_space<vmem>>, vector<2x8x8x4xf32>
    tpu.vector_store %arg9[%c0_25, %c1, %c1_26, %c0_27], %16 {strides = array<i32>} : memref<2x10x16x4xf32, #tpu.memory_space<vmem>>, vector<2x8x8x4xf32>,
    %c0_28 = arith.constant 0 : index
    %c0_29 = arith.constant 0 : index
    %c0_30 = arith.constant 0 : index
    %c0_31 = arith.constant 0 : index
    %18 = vector.load %arg9[%c0_28, %c0_29, %c0_30, %c0_31] : memref<2x10x16x4xf32, #tpu.memory_space<vmem>>, vector<2x8x8x4xf32>
    %c0_32 = arith.constant 0 : index
    %c0_33 = arith.constant 0 : index
    %c1_34 = arith.constant 1 : index
    %c0_35 = arith.constant 0 : index
    %19 = vector.load %arg9[%c0_32, %c0_33, %c1_34, %c0_35] : memref<2x10x16x4xf32, #tpu.memory_space<vmem>>, vector<2x8x8x4xf32>
    %c0_36 = arith.constant 0 : index
    %c0_37 = arith.constant 0 : index
    %c2 = arith.constant 2 : index
    %c0_38 = arith.constant 0 : index
    %20 = vector.load %arg9[%c0_36, %c0_37, %c2, %c0_38] : memref<2x10x16x4xf32, #tpu.memory_space<vmem>>, vector<2x8x8x4xf32>
    %c0_39 = arith.constant 0 : index
    %c1_40 = arith.constant 1 : index
    %c0_41 = arith.constant 0 : index
    %c0_42 = arith.constant 0 : index
    %21 = vector.load %arg9[%c0_39, %c1_40, %c0_41, %c0_42] : memref<2x10x16x4xf32, #tpu.memory_space<vmem>>, vector<2x8x8x4xf32>
    %c0_43 = arith.constant 0 : index
    %c1_44 = arith.constant 1 : index
    %c1_45 = arith.constant 1 : index
    %c0_46 = arith.constant 0 : index
    %22 = vector.load %arg9[%c0_43, %c1_44, %c1_45, %c0_46] : memref<2x10x16x4xf32, #tpu.memory_space<vmem>>, vector<2x8x8x4xf32>
    %c0_47 = arith.constant 0 : index
    %c1_48 = arith.constant 1 : index
    %c2_49 = arith.constant 2 : index
    %c0_50 = arith.constant 0 : index
    %23 = vector.load %arg9[%c0_47, %c1_48, %c2_49, %c0_50] : memref<2x10x16x4xf32, #tpu.memory_space<vmem>>, vector<2x8x8x4xf32>
    %c0_51 = arith.constant 0 : index
    %c2_52 = arith.constant 2 : index
    %c0_53 = arith.constant 0 : index
    %c0_54 = arith.constant 0 : index
    %24 = vector.load %arg9[%c0_51, %c2_52, %c0_53, %c0_54] : memref<2x10x16x4xf32, #tpu.memory_space<vmem>>, vector<2x8x8x4xf32>
    %c0_55 = arith.constant 0 : index
    %c2_56 = arith.constant 2 : index
    %c1_57 = arith.constant 1 : index
    %c0_58 = arith.constant 0 : index
    %25 = vector.load %arg9[%c0_55, %c2_56, %c1_57, %c0_58] : memref<2x10x16x4xf32, #tpu.memory_space<vmem>>, vector<2x8x8x4xf32>
    %c0_59 = arith.constant 0 : index
    %c2_60 = arith.constant 2 : index
    %c2_61 = arith.constant 2 : index
    %c0_62 = arith.constant 0 : index
    %26 = vector.load %arg9[%c0_59, %c2_60, %c2_61, %c0_62] : memref<2x10x16x4xf32, #tpu.memory_space<vmem>>, vector<2x8x8x4xf32>
    %27 = tpu.concatenate %18, %19, %20, %21, %22, %23, %24, %25, %26 in 3 : vector<2x8x8x4xf32>, vector<2x8x8x4xf32>, vector<2x8x8x4xf32>, vector<2x8x8x4xf32>, vector<2x8x8x4xf32>, vector<2x8x8x4xf32>, vector<2x8x8x4xf32>, vector<2x8x8x4xf32>, vector<2x8x8x4xf32> -> vector<2x8x8x36xf32>
    %28 = vector.shape_cast %27 : vector<2x8x8x36xf32> to vector<128x36xf32>
    %29 = arith.truncf %28 : vector<128x36xf32> to vector<128x36xbf16>
    %c0_63 = arith.constant 0 : index
    %c0_64 = arith.constant 0 : index
    %30 = vector.load %arg4[%c0_63, %c0_64] : memref<36x4xbf16, #tpu.memory_space<vmem>>, vector<36x4xbf16>
    %cst_65 = arith.constant dense<0.000000e+00> : vector<128x4xf32>
    %31 = tpu.matmul %29, %30, %cst_65 {dimension_numbers = #tpu.dot_dimension_numbers<[1], [0], [0], [1], [0, 0, 1, 1], [], []>} : vector<128x36xbf16>, vector<36x4xbf16>, vector<128x4xf32> -> vector<128x4xf32>
    %c0_66 = arith.constant 0 : index
    %c0_67 = arith.constant 0 : index
    %32 = vector.load %arg5[%c0_66, %c0_67] : memref<1x4xf32, #tpu.memory_space<vmem>>, vector<1x4xf32>
    %33 = vector.broadcast %32 : vector<1x4xf32> to vector<128x4xf32>
    %34 = arith.addf %31, %33 : vector<128x4xf32>
    %cst_68 = arith.constant 0.000000e+00 : f32
    %35 = vector.broadcast %cst_68 : f32 to vector<128x4xf32>
    %36 = arith.maximumf %34, %35 : vector<128x4xf32>
    %37 = arith.truncf %36 : vector<128x4xf32> to vector<128x4xbf16>
    %c0_69 = arith.constant 0 : index
    %c0_70 = arith.constant 0 : index
    %38 = vector.load %arg6[%c0_69, %c0_70] : memref<4x16xbf16, #tpu.memory_space<vmem>>, vector<4x16xbf16>
    %cst_71 = arith.constant dense<0.000000e+00> : vector<128x16xf32>
    %39 = tpu.matmul %37, %38, %cst_71 {dimension_numbers = #tpu.dot_dimension_numbers<[1], [0], [0], [1], [0, 0, 1, 1], [], []>} : vector<128x4xbf16>, vector<4x16xbf16>, vector<128x16xf32> -> vector<128x16xf32>
    %c0_72 = arith.constant 0 : index
    %c0_73 = arith.constant 0 : index
    %40 = vector.load %arg7[%c0_72, %c0_73] : memref<1x16xf32, #tpu.memory_space<vmem>>, vector<1x16xf32>
    %41 = vector.broadcast %40 : vector<1x16xf32> to vector<128x16xf32>
    %42 = arith.addf %39, %41 : vector<128x16xf32>
    %43 = arith.addf %42, %1 : vector<128x16xf32>
    %cst_74 = arith.constant 0.000000e+00 : f32
    %44 = vector.broadcast %cst_74 : f32 to vector<128x16xf32>
    %45 = arith.maximumf %43, %44 : vector<128x16xf32>
    %46 = vector.shape_cast %45 : vector<128x16xf32> to vector<2x8x8x16xf32>
    %c0_75 = arith.constant 0 : index
    %c0_76 = arith.constant 0 : index
    %c0_77 = arith.constant 0 : index
    %c0_78 = arith.constant 0 : index
    %47 = vector.load %arg8[%c0_75, %c0_76, %c0_77, %c0_78] : memref<2x8x8x16xf32, #tpu.memory_space<vmem>>, vector<2x8x8x16xf32>
    tpu.vector_store %arg8[%c0_75, %c0_76, %c0_77, %c0_78], %46 {strides = array<i32>} : memref<2x8x8x16xf32, #tpu.memory_space<vmem>>, vector<2x8x8x16xf32>,
    return
  }
  func.func @transform_0(%arg0: i32) -> (i32, i32, i32, i32) {
    %c0_i32 = arith.constant 0 : i32
    %c0_i32_0 = arith.constant 0 : i32
    %c0_i32_1 = arith.constant 0 : i32
    %c0_i32_2 = arith.constant 0 : i32
    return %arg0, %c0_i32, %c0_i32_0, %c0_i32_1 : i32, i32, i32, i32
  }
  func.func @transform_1(%arg0: i32) -> (i32, i32) {
    %c0_i32 = arith.constant 0 : i32
    %c0_i32_0 = arith.constant 0 : i32
    %c0_i32_1 = arith.constant 0 : i32
    return %c0_i32, %c0_i32_0 : i32, i32
  }
  func.func @transform_2(%arg0: i32) -> (i32, i32) {
    %c0_i32 = arith.constant 0 : i32
    %c0_i32_0 = arith.constant 0 : i32
    %c0_i32_1 = arith.constant 0 : i32
    return %c0_i32, %c0_i32_0 : i32, i32
  }
  func.func @transform_3(%arg0: i32) -> (i32, i32) {
    %c0_i32 = arith.constant 0 : i32
    %c0_i32_0 = arith.constant 0 : i32
    %c0_i32_1 = arith.constant 0 : i32
    return %c0_i32, %c0_i32_0 : i32, i32
  }
  func.func @transform_4(%arg0: i32) -> (i32, i32) {
    %c0_i32 = arith.constant 0 : i32
    %c0_i32_0 = arith.constant 0 : i32
    %c0_i32_1 = arith.constant 0 : i32
    return %c0_i32, %c0_i32_0 : i32, i32
  }
  func.func @transform_5(%arg0: i32) -> (i32, i32) {
    %c0_i32 = arith.constant 0 : i32
    %c0_i32_0 = arith.constant 0 : i32
    %c0_i32_1 = arith.constant 0 : i32
    return %c0_i32, %c0_i32_0 : i32, i32
  }
  func.func @transform_6(%arg0: i32) -> (i32, i32) {
    %c0_i32 = arith.constant 0 : i32
    %c0_i32_0 = arith.constant 0 : i32
    %c0_i32_1 = arith.constant 0 : i32
    return %c0_i32, %c0_i32_0 : i32, i32
  }
  func.func @transform_7(%arg0: i32) -> (i32, i32, i32, i32) {
    %c0_i32 = arith.constant 0 : i32
    %c0_i32_0 = arith.constant 0 : i32
    %c0_i32_1 = arith.constant 0 : i32
    %c0_i32_2 = arith.constant 0 : i32
    return %arg0, %c0_i32, %c0_i32_0, %c0_i32_1 : i32, i32, i32, i32
  }
}

</mosaic_0001>

<bundles_post_ra>
// kernel: tpu_custom_call.1
= control target key start
LH: loop header
LB: loop body
LE: loop exit
PB: predicated region body
PF: predicated region fallthrough
CT: control target
= control target key end

     0   :  { %12 = vsyncpa [#allocation4], 0  ;;  %s3248_s0 = inlined_call_operand.hbm [shape: f32[4,8,8,16], index: 0, kind: input, shape index: {}]   ;;  %s3249_s1 = inlined_call_operand.vmem [shape: bf16[16,4], index: 1, kind: input, shape index: {}]   ;;  %s3250_s2 = inlined_call_operand.vmem [shape: f32[1,4], index: 2, kind: input, shape index: {}]   ;;  %s3251_s3 = inlined_call_operand.vmem [shape: bf16[36,4], index: 3, kind: input, shape index: {}]   ;;  %s3252_s4 = inlined_call_operand.vmem [shape: f32[1,4], index: 4, kind: input, shape index: {}]   ;;  %s3253_s5 = inlined_call_operand.vmem [shape: bf16[4,16], index: 5, kind: input, shape index: {}]   ;;  %s3254_s6 = inlined_call_operand.vmem [shape: f32[1,16], index: 6, kind: input, shape index: {}]   ;;  %s3255_s7 = inlined_call_operand.hbm [shape: f32[4,8,8,16], index: 7, kind: output, shape index: {}]  }
   0x1   :  { %14 = vsyncpa [#allocation4 + $0x1], 0 }
   0x2   :  { %15 = vsyncpa [#allocation5], 0 }
   0x3   :  { %17 = vsyncpa [#allocation5 + $0x1], 0  ;;  %s2482_s24 = smov 0   ;;  %s2484_s25 = smov 0  }
   0x4   :  { %s2486_s26 = smov 0   ;;  %s2488_s27 = smov 0  }
   0x5 LB: > { %s2503_s28 = sadd.s32 4294967295, %s2426_s27   ;;  %s1790_s29 = sadd.s32 4294967294, %s2426_s27   ;;  %s2426_s27 = sphi %s2488_s27, %s3270_s27   ;;  %s2422_s26 = sphi %s2486_s26, %s3269_s26   ;;  %s2418_s25 = sphi %s2484_s25, %s3268_s25   ;;  %s2414_s24 = sphi %s2482_s24, %s3267_s24  }
   0x6   : > { %s2507_s30 = sadd.s32 1, %s2426_s27   ;;  %s30_s8 = sadd.s32 1, %s2422_s26 }
   0x7   : > { %s27_s9 = ssub.s32 %s2426_s27, %s2507_s30  ;;  %p37_p0 = scmp.ne.s32.totalorder %s2422_s26, %s2418_s25 }
   0x8   : > { %p28_p1 = scmp.eq.s32.totalorder %s27_s9, 0  ;;  %p38_p2 = scmp.eq.s32.totalorder %s2426_s27, 0 }
   0x9   : > { %p43_p3 = scmp.ne.s32.totalorder %s2418_s25, %s2414_s24  ;;  %p44_p4 = scmp.eq.s32.totalorder %s2503_s28, 0 }
   0xa   : > { %s2519_s10 = scalar_select %p28_p1, %s2422_s26, %s30_s8  }
   0xb   : > { %p2521_p5 = por %p38_p2, %p37_p0  ;;  %p2525_p6 = por %p44_p4, %p43_p3 }
   0xc   : > { %p193_p7 = scmp.eq.s32.totalorder %s2503_s28, 1  ;;  %p199_p8 = scmp.eq.s32.totalorder %s1790_s29, 1 }
   0xd   : > { %p1944_p10 = scmp.lt.s32.totalorder %s2426_s27, 2  ;;  %s237_s15 = sand.u32 1, %s2422_s26  }
   0xe   : > { %p2532_p11 = por %p193_p7, %p37_p0  ;;  %p2536_p12 = por %p199_p8, %p43_p3 }
   0xf   : > { %s1838_s16 = sshll.u32 %s2426_s27, 11  ;;  %s1793_s17 = sshll.u32 %s237_s15, 7 }
  0x10   : > { %s3260_s13 = scalar_select %p2532_p11, 1, 0 }
  0x11   : > { %s3261_s14 = scalar_select %p2536_p12, 1, 0 }
  0x12   : > { %s2545_s20 = scalar_lea.hbm %s3248_s0, %s1838_s16  ;;  %s241_s21 = scalar_lea.vmem [#allocation3], %s1793_s17 }
  0x13   : > { %s249_s22 = sshll.u32 %s241_s21, 4  ;;  %p2549_p13 = pnand %p1944_p10, %p2521_p5  ;;  %s2553_s22 = int_to_ptr.vmem [resolvable:$true] %s249_s22 }
  0x14   : > { %s2555_s29 = scalar_lea.sflag [#allocation4], %s237_s15  ;;  %s2330_s8 = scalar_lea.hbm %s2545_s20, 2048 }
  0x15   : > { %p2331_p0 = scmp.ne.s32.totalorder %s2545_s20, %s2330_s8  ;;  %p2332_p1 = pneg %p2549_p13 }
  0x16   : > { %s2335_s16 = scalar_lea.hbm %s3248_s0, 4096  ;;  %p2336_p4 = scmp.lt.u32.totalorder %s2545_s20, %s3248_s0 }
  0x17   : > { %p2333_p2 = pnand %p2332_p1, %p2331_p0  ;;  %p2337_p5 = scmp.lt.u32.totalorder %s2335_s16, %s2330_s8 }
  0x18   : > { %p2339_p8 = scmp.lt.u32.totalorder %s2330_s8, %s2545_s20 }
  0x19   : > { %p2334_p3 = pneg %p2333_p2  ;;  %p2338_p7 = por %p2337_p5, %p2336_p4 }
  0x1b   : > { %p2340_p10 = por %p2339_p8, %p2338_p7 }
  0x1d   : > { %p2341_p9 = pnand %p2340_p10, %p2334_p3 }
  0x1f   : > { %2344 = shalt.err (!%p2341_p9)
}
  0x20   : > { %s2345_s15 = scalar_lea.vmem %s2553_s22, 2048  ;;  %s2428_s19 = smov [#allocation3]  }
  0x21   : > { %p2346_p0 = scmp.ne.s32.totalorder %s2553_s22, %s2345_s15  ;;  %s2350_s21 = sshll.u32 %s2428_s19, 4  ;;  %s2351_s21 = int_to_ptr.vmem [resolvable:$false] %s2350_s21 }
  0x22   : > { %s2352_s9 = scalar_lea.vmem %s2351_s21, 4096  ;;  %p2353_p11 = scmp.lt.s32.totalorder %s2553_s22, %s2351_s21 }
  0x23   : > { %p2348_p2 = pnand %p2346_p0, %p2332_p1  ;;  %p2354_p4 = scmp.lt.s32.totalorder %s2352_s9, %s2345_s15 }
  0x25   : > { %p2349_p12 = pneg %p2348_p2  ;;  %p2355_p5 = por %p2354_p4, %p2353_p11 }
  0x27   : > { %p2356_p7 = pnand %p2355_p5, %p2349_p12 }
  0x29   : > { %2359 = shalt.err (!%p2356_p7)
}
  0x2a   : > { %s2429_s8 = smov 128   ;;  %s2430_s11 = smov 8  }
  0x2b   : > { %1939 = dma.hbm_to_vmem [thread:$0]  (!%p2549_p13), %s2545_s20, 2048, %s2553_s22, %s2555_s29, %s2429_s8, %s2429_s8, %s2430_s11  }
  0x2c   : > { %p1797_p9 = scmp.ge.s32.totalorder %s2426_s27, 1  ;;  %p257_p1 = scmp.lt.s32.totalorder %s2426_s27, 3 }
  0x2e   : > { %p258_p3 = pnand %p1797_p9, %p257_p1 }
  0x2f   : > { %s2586_s16 = sand.u32 (!%p258_p3), 1, %s2418_s25  }
  0x30   : > { %261 = sbr.rel (%p258_p3) target bundleno = 992 (0x3e0), region = 48  ;;  %s3257_s17 = sshll.u32 (!%p258_p3), %s2586_s16, 7 }
  0x31   : > { %s264_s18 = scalar_lea.sflag (!%p258_p3), [#allocation4], %s2586_s16  ;;  %s2592_s15 = scalar_lea.vmem (!%p258_p3), [#allocation3], %s3257_s17 }
  0x37   : > { %2405 = dma.done.wait (%p2525_p6), %s264_s18, 2048  }
  0x38   : > { %2407 = vsyncadd (%p2525_p6), %s264_s18, 4294965248  ;;  %v2310_v0 = vld [vmem:[%s3249_s1] sm:$0xff]   ;;  %v302_v2 = vld [vmem:[%s2592_s15 + $0x8] sm:$0xff]  ;;  %vm340_vm0 = vcmask 130048   ;;  %vm478_vm1 = vcmask 31744   ;;  %vm488_vm2 = vcmask 24576  }
  0x39   : > { %v301_v1 = vld [vmem:[%s2592_s15] sm:$0xff]  ;;  %1870 = vmatprep.subr.bf16.mxu0 %v2310_v0  ;;  %1928 = vmatprep.subr.bf16.mxu1 %v2310_v0  ;;  %v310_v5 = vld [vmem:[%s2592_s15 + $0x48] sm:$0xff]  ;;  %v303_v6 = vld [vmem:[%s2592_s15 + $0x10] sm:$0xff]  ;;  %v2431_v25 = vmov 0.0   ;;  %s2432_s29 = smov 8   ;;  %s2433_s19 = smov 4  }
  0x3a   : > { %v309_v3 = vld [vmem:[%s2592_s15 + $0x40] sm:$0xff]  ;;  %v317_v4 = vpack.c.bf16 %v302_v2, %v301_v1  ;;  %v304_v7 = vld [vmem:[%s2592_s15 + $0x18] sm:$0xff]  ;;  %1871 = vmatpush3.bf16.msra.mxu0 %v2310_v0  ;;  %1929 = vmatpush3.bf16.msra.mxu1 %v2310_v0  ;;  %v311_v10 = vld [vmem:[%s2592_s15 + $0x50] sm:$0xff]  ;;  %479 = vst.msk [vmem:[#allocation2] sm:$0xff] %vm478_vm1, %v2431_v25  ;;  %s2434_s21 = smov 12   ;;  %s2435_s9 = smov 16  }
  0x3b   : > { %v321_v8 = vpack.c.bf16 %v310_v5, %v309_v3  ;;  %v318_v9 = vpack.c.bf16 %v304_v7, %v303_v6  ;;  %v312_v11 = vld [vmem:[%s2592_s15 + $0x58] sm:$0xff]  ;;  %v305_v12 = vld [vmem:[%s2592_s15 + $0x20] sm:$0xff]  ;;  %v306_v14 = vld [vmem:[%s2592_s15 + $0x28] sm:$0xff]  ;;  %480 = vst.msk [vmem:[#allocation2 + $0x8] sm:$0xff] %vm478_vm1, %v2431_v25  ;;  %s2436_s8 = smov 20   ;;  %s2437_s11 = smov 24  }
  0x3c   : > { %1872 = vmatprep.mubr.msk.bf16.mxu0 %vm340_vm0, %v317_v4  ;;  %v322_v13 = vpack.c.bf16 %v312_v11, %v311_v10  ;;  %v313_v15 = vld [vmem:[%s2592_s15 + $0x60] sm:$0xff]  ;;  %v314_v16 = vld [vmem:[%s2592_s15 + $0x68] sm:$0xff]  ;;  %v319_v17 = vpack.c.bf16 %v306_v14, %v305_v12  ;;  %v307_v19 = vld [vmem:[%s2592_s15 + $0x30] sm:$0xff]  ;;  %510 = vst.msk [vmem:[#allocation2 + $0x19] sm:$0x1] %vm488_vm2, %v2431_v25  ;;  %s2438_s18 = smov 28  }
  0x3d   : > { %1880 = vmatprep.mubr.msk.bf16.mxu1 %vm340_vm0, %v321_v8  ;;  %v323_v18 = vpack.c.bf16 %v314_v16, %v313_v15  ;;  %v308_v20 = vld [vmem:[%s2592_s15 + $0x38] sm:$0xff]  ;;  %v315_v21 = vld [vmem:[%s2592_s15 + $0x70] sm:$0xff]  ;;  %1873 = vmatmul.mubr.msk.bf16.vlgmr.msra.gmra.mrb[0].mxu0 %vm340_vm0, %v318_v9  ;;  %481 = vst.msk [vmem:[#allocation2 + $0xa0] sm:$0xff] %vm478_vm1, %v2431_v25  ;;  %482 = vst.msk [vmem:[#allocation2 + $0xa8] sm:$0xff] %vm478_vm1, %v2431_v25  ;;  %s2439_s20 = smov 32   ;;  %vm1397_vm3 = vcmask 1041408  }
  0x3e   : > { %1881 = vmatmul.mubr.msk.bf16.vlgmr.msra.gmra.mrb[0].mxu1 %vm340_vm0, %v322_v13  ;;  %v316_v22 = vld [vmem:[%s2592_s15 + $0x78] sm:$0xff]  ;;  %1876 = vmatprep.mubr.msk.bf16.mxu0 %vm340_vm0, %v319_v17  ;;  %v320_v23 = vpack.c.bf16 %v308_v20, %v307_v19  ;;  %484 = vst.msk [vmem:[#allocation2 + $0x90] sm:$0xff] %vm478_vm1, %v2431_v25  ;;  %485 = vst.msk [vmem:[#allocation2 + $0x98] sm:$0xff] %vm478_vm1, %v2431_v25  ;;  %v1800_v26 = vld [vmem:[%s3250_s2] ss:$0 sm:$0xff]  ;;  %vm1219_vm4 = vcmask 64512  }
  0x3f   : > { %1884 = vmatprep.mubr.msk.bf16.mxu1 %vm340_vm0, %v323_v18  ;;  %v324_v24 = vpack.c.bf16 %v316_v22, %v315_v21  ;;  %486 = vst.msk [vmem:[#allocation2 + $0x130] sm:$0xff] %vm478_vm1, %v2431_v25  ;;  %487 = vst.msk [vmem:[#allocation2 + $0x138] sm:$0xff] %vm478_vm1, %v2431_v25  ;;  %vm1236_vm5 = vcmask 97280   ;;  %vm1269_vm6 = vcmask 162816   ;;  %vm1286_vm7 = vcmask 195584   ;;  %s1840_s23 = sshll.u32 %s2503_s28, 11 }
  0x40   : > { %490 = vst.msk [vmem:[#allocation2 + $0x10] sm:$0x1] %vm488_vm2, %v2431_v25  ;;  %491 = vst.msk [vmem:[#allocation2 + $0x20] sm:$0x1] %vm488_vm2, %v2431_v25  ;;  %vm1303_vm8 = vcmask 228352   ;;  %vm1320_vm9 = vcmask 261120  }
  0x41   : > { %492 = vst.msk [vmem:[#allocation2 + $0x30] sm:$0x1] %vm488_vm2, %v2431_v25  ;;  %493 = vst.msk [vmem:[#allocation2 + $0x40] sm:$0x1] %vm488_vm2, %v2431_v25  ;;  %vm1372_vm10 = vcmask 293888   ;;  %s1703_s28 = scalar_lea.sflag [#allocation5], %s2586_s16 }
  0x42   : > { %494 = vst.msk [vmem:[#allocation2 + $0x50] sm:$0x1] %vm488_vm2, %v2431_v25  ;;  %495 = vst.msk [vmem:[#allocation2 + $0x60] sm:$0x1] %vm488_vm2, %v2431_v25  ;;  %v562_v0 = vld [vmem:[#allocation2 + $0x1] sm:$0xff]  ;;  %p3264_p11 = scmp.ne.s32.totalorder %s3260_s13, 0 }
  0x43   : > { %496 = vst.msk [vmem:[#allocation2 + $0x70] sm:$0x1] %vm488_vm2, %v2431_v25  ;;  %497 = vst.msk [vmem:[#allocation2 + $0x80] sm:$0x1] %vm488_vm2, %v2431_v25 }
  0x44   : > { %500 = vst.msk [vmem:[#allocation2 + $0xb0] sm:$0x1] %vm488_vm2, %v2431_v25  ;;  %501 = vst.msk [vmem:[#allocation2 + $0xc0] sm:$0x1] %vm488_vm2, %v2431_v25  ;;  %v570_v7 = vld [vmem:[#allocation2 + $0xa1] sm:$0xff] }
  0x45   : > { %1877 = vmatmul.mubr.msk.bf16.gmra.mrb[4].mxu0 %vm340_vm0, %v320_v23  ;;  %502 = vst.msk [vmem:[#allocation2 + $0xd0] sm:$0x1] %vm488_vm2, %v2431_v25  ;;  %503 = vst.msk [vmem:[#allocation2 + $0xe0] sm:$0x1] %vm488_vm2, %v2431_v25 }
  0x46   : > { %1885 = vmatmul.mubr.msk.bf16.gmra.mrb[4].mxu1 %vm340_vm0, %v324_v24  ;;  %504 = vst.msk [vmem:[#allocation2 + $0xf0] sm:$0x1] %vm488_vm2, %v2431_v25  ;;  %505 = vst.msk [vmem:[#allocation2 + $0x100] sm:$0x1] %vm488_vm2, %v2431_v25 }
  0x47   : > { %506 = vst.msk [vmem:[#allocation2 + $0x110] sm:$0x1] %vm488_vm2, %v2431_v25  ;;  %507 = vst.msk [vmem:[#allocation2 + $0x120] sm:$0x1] %vm488_vm2, %v2431_v25 }
  0x48   : > { %511 = vst.msk [vmem:[#allocation2 + $0x29] sm:$0x1] %vm488_vm2, %v2431_v25  ;;  %512 = vst.msk [vmem:[#allocation2 + $0x39] sm:$0x1] %vm488_vm2, %v2431_v25 }
  0x49   : > { %513 = vst.msk [vmem:[#allocation2 + $0x49] sm:$0x1] %vm488_vm2, %v2431_v25  ;;  %514 = vst.msk [vmem:[#allocation2 + $0x59] sm:$0x1] %vm488_vm2, %v2431_v25 }
  0x4a   : > { %515 = vst.msk [vmem:[#allocation2 + $0x69] sm:$0x1] %vm488_vm2, %v2431_v25  ;;  %516 = vst.msk [vmem:[#allocation2 + $0x79] sm:$0x1] %vm488_vm2, %v2431_v25 }
  0x4b   : > { %517 = vst.msk [vmem:[#allocation2 + $0x89] sm:$0x1] %vm488_vm2, %v2431_v25  ;;  %520 = vst.msk [vmem:[#allocation2 + $0xb9] sm:$0x1] %vm488_vm2, %v2431_v25 }
  0x4c   : > { %521 = vst.msk [vmem:[#allocation2 + $0xc9] sm:$0x1] %vm488_vm2, %v2431_v25  ;;  %522 = vst.msk [vmem:[#allocation2 + $0xd9] sm:$0x1] %vm488_vm2, %v2431_v25 }
  0x4d   : > { %523 = vst.msk [vmem:[#allocation2 + $0xe9] sm:$0x1] %vm488_vm2, %v2431_v25  ;;  %524 = vst.msk [vmem:[#allocation2 + $0xf9] sm:$0x1] %vm488_vm2, %v2431_v25 }
  0x4e   : > { %525 = vst.msk [vmem:[#allocation2 + $0x109] sm:$0x1] %vm488_vm2, %v2431_v25  ;;  %526 = vst.msk [vmem:[#allocation2 + $0x119] sm:$0x1] %vm488_vm2, %v2431_v25 }
  0x4f   : > { %527 = vst.msk [vmem:[#allocation2 + $0x129] sm:$0x1] %vm488_vm2, %v2431_v25  ;;  %489 = vst.msk [vmem:[#allocation2] sm:$0x1] %vm488_vm2, %v2431_v25 }
  0x50   : > { %509 = vst.msk [vmem:[#allocation2 + $0x9] sm:$0x1] %vm488_vm2, %v2431_v25  ;;  %498 = vst.msk [vmem:[#allocation2 + $0x90] sm:$0x1] %vm488_vm2, %v2431_v25 }
  0x51   : > { %499 = vst.msk [vmem:[#allocation2 + $0xa0] sm:$0x1] %vm488_vm2, %v2431_v25  ;;  %508 = vst.msk [vmem:[#allocation2 + $0x130] sm:$0x1] %vm488_vm2, %v2431_v25 }
  0x52   : > { %518 = vst.msk [vmem:[#allocation2 + $0x99] sm:$0x1] %vm488_vm2, %v2431_v25  ;;  %519 = vst.msk [vmem:[#allocation2 + $0xa9] sm:$0x1] %vm488_vm2, %v2431_v25 }
  0x53   : > { %528 = vst.msk [vmem:[#allocation2 + $0x139] sm:$0x1] %vm488_vm2, %v2431_v25 }
  0x57   : > { %v578_v63 = vld [vmem:[#allocation2 + $0x2] sm:$0xff] }
  0x59   : > { %v586_v8 = vld [vmem:[#allocation2 + $0xa2] sm:$0xff] }
 0x110   : > { %v1874_v27 = vpop.f32.mrb[0].mxu0 }
 0x111   : > { %v1882_v28 = vpop.f32.mrb[0].mxu1  ;;  %v408_v29 = vadd.f32 %v1874_v27, %v1800_v26  ;;  %v399_v30 = vpop.f32.mrb[1].mxu0 }
 0x112   : > { %v440_v31 = vadd.f32 %v1882_v28, %v1800_v26  ;;  %v431_v32 = vpop.f32.mrb[1].mxu1  ;;  %v400_v33 = vadd.f32 %v1800_v26, %v399_v30  ;;  %v1875_v34 = vpop.f32.mrb[2].mxu0 }
 0x113   : > { %v432_v35 = vadd.f32 %v1800_v26, %v431_v32  ;;  %v1883_v36 = vpop.f32.mrb[2].mxu1  ;;  %v464_v37 = vmax.f32 %v408_v29, 0.0  ;;  %v411_v39 = vadd.f32 %v1875_v34, %v1800_v26  ;;  %v402_v40 = vpop.f32.mrb[3].mxu0 }
 0x114   : > { %v472_v38 = vmax.f32 %v440_v31, 0.0  ;;  %v443_v41 = vadd.f32 %v1883_v36, %v1800_v26  ;;  %v434_v42 = vpop.f32.mrb[3].mxu1  ;;  %v462_v43 = vmax.f32 %v400_v33, 0.0  ;;  %v403_v45 = vadd.f32 %v1800_v26, %v402_v40 }
 0x115   : > { %v470_v44 = vmax.f32 %v432_v35, 0.0  ;;  %v435_v46 = vadd.f32 %v1800_v26, %v434_v42  ;;  %532 = vst.msk [vmem:[#allocation2 + $0x31] sm:$0xff] %vm478_vm1, %v464_v37  ;;  %v465_v47 = vmax.f32 %v411_v39, 0.0 }
 0x116   : > { %540 = vst.msk [vmem:[#allocation2 + $0xd1] sm:$0xff] %vm478_vm1, %v472_v38  ;;  %v473_v48 = vmax.f32 %v443_v41, 0.0  ;;  %530 = vst.msk [vmem:[#allocation2 + $0x11] sm:$0xff] %vm478_vm1, %v462_v43  ;;  %v463_v49 = vmax.f32 %v403_v45, 0.0 }
 0x117   : > { %538 = vst.msk [vmem:[#allocation2 + $0xb1] sm:$0xff] %vm478_vm1, %v470_v44  ;;  %v471_v50 = vmax.f32 %v435_v46, 0.0  ;;  %533 = vst.msk [vmem:[#allocation2 + $0x41] sm:$0xff] %vm478_vm1, %v465_v47 }
 0x118   : > { %541 = vst.msk [vmem:[#allocation2 + $0xe1] sm:$0xff] %vm478_vm1, %v473_v48  ;;  %531 = vst.msk [vmem:[#allocation2 + $0x21] sm:$0xff] %vm478_vm1, %v463_v49  ;;  %v1878_v51 = vpop.f32.mrb[4].mxu0 }
 0x119   : > { %539 = vst.msk [vmem:[#allocation2 + $0xc1] sm:$0xff] %vm478_vm1, %v471_v50  ;;  %v1886_v52 = vpop.f32.mrb[4].mxu1  ;;  %v424_v53 = vadd.f32 %v1878_v51, %v1800_v26  ;;  %v415_v55 = vpop.f32.mrb[5].mxu0 }
 0x11a   : > { %v456_v54 = vadd.f32 %v1886_v52, %v1800_v26  ;;  %v447_v56 = vpop.f32.mrb[5].mxu1  ;;  %v416_v57 = vadd.f32 %v1800_v26, %v415_v55  ;;  %v1879_v59 = vpop.f32.mrb[6].mxu0 }
 0x11b   : > { %v448_v58 = vadd.f32 %v1800_v26, %v447_v56  ;;  %v1887_v60 = vpop.f32.mrb[6].mxu1  ;;  %v468_v61 = vmax.f32 %v424_v53, 0.0  ;;  %v427_v1 = vadd.f32 %v1879_v59, %v1800_v26  ;;  %v418_v2 = vpop.f32.mrb[7].mxu0 }
 0x11c   : > { %v476_v62 = vmax.f32 %v456_v54, 0.0  ;;  %v459_v3 = vadd.f32 %v1887_v60, %v1800_v26  ;;  %v450_v4 = vpop.f32.mrb[7].mxu1  ;;  %v466_v5 = vmax.f32 %v416_v57, 0.0  ;;  %v419_v9 = vadd.f32 %v1800_v26, %v418_v2  ;;  %v2704_v25 = vld [vmem:[#allocation2 + $0x30] sm:$0xff]  ;;  %v2311_v60 = vld [vmem:[%s3251_s3] sm:$0xff]   ;;  %v2312_v2 = vld [vmem:[%s3251_s3 + $0x8] sm:$0xff]  }
 0x11d   : > { %v474_v6 = vmax.f32 %v448_v58, 0.0  ;;  %v451_v10 = vadd.f32 %v1800_v26, %v450_v4  ;;  %536 = vst.msk [vmem:[#allocation2 + $0x71] sm:$0xff] %vm478_vm1, %v468_v61  ;;  %v579_v11 = vld [vmem:[#allocation2 + $0x12] sm:$0xff]  ;;  %v469_v14 = vmax.f32 %v427_v1, 0.0  ;;  %1888 = vmatprep.subr.bf16.mxu1 %v2311_v60 }
 0x11e   : > { %544 = vst.msk [vmem:[#allocation2 + $0x111] sm:$0xff] %vm478_vm1, %v476_v62  ;;  %v563_v12 = vld [vmem:[#allocation2 + $0x11] sm:$0xff]  ;;  %v477_v15 = vmax.f32 %v459_v3, 0.0  ;;  %534 = vst.msk [vmem:[#allocation2 + $0x51] sm:$0xff] %vm478_vm1, %v466_v5  ;;  %v1995_v16 = vpack.i.bf16 %v579_v11, %v578_v63  ;;  %v467_v19 = vmax.f32 %v419_v9, 0.0  ;;  %v2700_v23 = vld [vmem:[#allocation2 + $0x40] sm:$0xff]  ;;  %1889 = vmatpush3.bf16.msra.mxu1 %v2311_v60 }
 0x11f   : > { %v2686_v13 = vld [vmem:[#allocation2 + $0xb1] sm:$0xff]  ;;  %542 = vst.msk [vmem:[#allocation2 + $0xf1] sm:$0xff] %vm478_vm1, %v474_v6  ;;  %v1990_v17 = vpack.i.bf16 %v563_v12, %v562_v0  ;;  %537 = vst.msk [vmem:[#allocation2 + $0x81] sm:$0xff] %vm478_vm1, %v469_v14  ;;  %v475_v20 = vmax.f32 %v451_v10, 0.0  ;;  %v564_v24 = vld [vmem:[#allocation2 + $0x21] sm:$0xff]  ;;  %v2010_v27 = vpack.i.bf16 %v2700_v23, %v2704_v25  ;;  %1890 = vmatprep.subr.bf16.mxu1 %v2312_v2 }
 0x120   : > { %v2690_v18 = vld [vmem:[#allocation2 + $0xb2] sm:$0xff]  ;;  %545 = vst.msk [vmem:[#allocation2 + $0x121] sm:$0xff] %vm478_vm1, %v477_v15  ;;  %1996 = vrot.lane.b32.xlu1 %v1995_v16, %s2432_s29  ;;  %v2000_v21 = vpack.i.bf16 %v2686_v13, %v570_v7  ;;  %535 = vst.msk [vmem:[#allocation2 + $0x61] sm:$0xff] %vm478_vm1, %v467_v19  ;;  %v2708_v29 = vld [vmem:[#allocation2 + $0x41] sm:$0xff]  ;;  %v2055_v37 = vpack.i.bf16 %v564_v24, %v563_v12 }
 0x121   : > { %1991 = vrot.lane.b32.xlu0 %v1990_v17, %s2433_s19  ;;  %v2005_v22 = vpack.i.bf16 %v2690_v18, %v586_v8  ;;  %543 = vst.msk [vmem:[#allocation2 + $0x101] sm:$0xff] %vm478_vm1, %v475_v20  ;;  %v565_v26 = vld [vmem:[#allocation2 + $0x31] sm:$0xff]  ;;  %v2710_v30 = vld [vmem:[#allocation2 + $0x20] sm:$0xff]  ;;  %v2313_v3 = vld [vmem:[%s3251_s3 + $0x10] ss:$0 sps:$4 sm:$0x33]  }
 0x122   : > { %v2040_v28 = vpack.i.bf16 %v565_v26, %v564_v24  ;;  %v2714_v31 = vld [vmem:[#allocation2 + $0x10] sm:$0xff]  ;;  %v2015_v32 = vpack.i.bf16 %v2708_v29, %v565_v26  ;;  %v2719_v34 = vld [vmem:[#allocation2 + $0x42] sm:$0xff]  ;;  %v2065_v46 = vpack.i.bf16 %v2704_v25, %v2710_v30  ;;  %1891 = vmatpush3.bf16.msra.mxu1 %v2312_v2  ;;  %v1399_v5 = vsel %vm1397_vm3, %v2313_v3, 0 }
 0x123   : > { %v2050_v33 = vpack.i.bf16 %v2710_v30, %v2714_v31  ;;  %v628_v35 = vld [vmem:[#allocation2 + $0x32] sm:$0xff]  ;;  %v2726_v39 = vld [vmem:[#allocation2 + $0xe0] sm:$0xff]  ;;  %1930 = vmatprep.subr.msk.bf16.mxu1 %vm1397_vm3, %v2313_v3 }
 0x124   : > { %2001 = vrot.lane.b32.xlu1 %v2000_v21, %s2433_s19  ;;  %v2020_v36 = vpack.i.bf16 %v2719_v34, %v628_v35  ;;  %v2724_v38 = vld [vmem:[#allocation2 + $0xd0] sm:$0xff]  ;;  %v627_v40 = vld [vmem:[#allocation2 + $0x22] sm:$0xff] }
 0x125   : > { %2006 = vrot.lane.b32.xlu0 %v2005_v22, %s2432_s29  ;;  %v2025_v41 = vpack.i.bf16 %v2726_v39, %v2724_v38  ;;  %v2060_v42 = vpack.i.bf16 %v627_v40, %v579_v11  ;;  %v620_v43 = vld [vmem:[#allocation2 + $0xd1] sm:$0xff]  ;;  %v621_v44 = vld [vmem:[#allocation2 + $0xe1] sm:$0xff]  ;;  %v2045_v50 = vpack.i.bf16 %v628_v35, %v627_v40 }
 0x126   : > { %v2030_v45 = vpack.i.bf16 %v621_v44, %v620_v43  ;;  %v636_v47 = vld [vmem:[#allocation2 + $0xd2] sm:$0xff]  ;;  %v2736_v48 = vld [vmem:[#allocation2 + $0xe2] sm:$0xff]  ;;  %1893 = vmatpush3.bf16.msra.mxu1 %v1399_v5 }
 0x127   : > { %v2035_v49 = vpack.i.bf16 %v2736_v48, %v636_v47  ;;  %v572_v51 = vld [vmem:[#allocation2 + $0xc1] sm:$0xff]  ;;  %v2743_v52 = vld [vmem:[#allocation2 + $0xb0] sm:$0xff] }
 0x128   : > { %2011 = vrot.lane.b32.xlu1 %v2010_v27, %s2434_s21  ;;  %v2745_v53 = vld [vmem:[#allocation2 + $0xc0] sm:$0xff]  ;;  %v2080_v54 = vpack.i.bf16 %v620_v43, %v572_v51  ;;  %v2095_v58 = vpack.i.bf16 %v572_v51, %v2686_v13  ;;  %v2754_v59 = vld [vmem:[#allocation2 + $0x50] sm:$0xff] }
 0x129   : > { %2041 = vrot.lane.b32.xlu0 %v2040_v28, %s2433_s19  ;;  %v2090_v55 = vpack.i.bf16 %v2745_v53, %v2743_v52  ;;  %v588_v56 = vld [vmem:[#allocation2 + $0xc2] sm:$0xff]  ;;  %v2120_v61 = vpack.i.bf16 %v2754_v59, %v2700_v23  ;;  %v2764_v63 = vld [vmem:[#allocation2 + $0x51] sm:$0xff]  ;;  %v2105_v1 = vpack.i.bf16 %v2724_v38, %v2745_v53 }
 0x12a   : > { %v2085_v57 = vpack.i.bf16 %v636_v47, %v588_v56  ;;  %v2100_v62 = vpack.i.bf16 %v588_v56, %v2690_v18  ;;  %v2125_v0 = vpack.i.bf16 %v2764_v63, %v2708_v29  ;;  %v2780_v4 = vld [vmem:[#allocation2 + $0xf0] sm:$0xff]  ;;  %v601_v12 = vld [vmem:[#allocation2 + $0x80] sm:$0xff] }
 0x12b   : > { %v2145_v6 = vpack.i.bf16 %v2780_v4, %v2726_v39  ;;  %v2788_v7 = vld [vmem:[#allocation2 + $0xf1] sm:$0xff]  ;;  %v617_v17 = vld [vmem:[#allocation2 + $0x81] sm:$0xff] }
 0x12c   : > { %2016 = vrot.lane.b32.xlu1 %v2015_v32, %s2435_s9  ;;  %v678_v8 = vld [vmem:[#allocation2 + $0x52] sm:$0xff]  ;;  %v2150_v9 = vpack.i.bf16 %v2788_v7, %v621_v44  ;;  %v633_v20 = vld [vmem:[#allocation2 + $0x82] sm:$0xff] }
 0x12d   : > { %2051 = vrot.lane.b32.xlu0 %v2050_v33, %s2434_s21  ;;  %v2135_v10 = vpack.i.bf16 %v678_v8, %v2719_v34  ;;  %v2796_v11 = vld [vmem:[#allocation2 + $0x70] sm:$0xff]  ;;  %v2809_v27 = vld [vmem:[#allocation2 + $0x60] sm:$0xff] }
 0x12e   : > { %v2798_v13 = vld [vmem:[#allocation2 + $0xf2] sm:$0xff]  ;;  %v2170_v14 = vpack.i.bf16 %v601_v12, %v2796_v11  ;;  %v2230_v29 = vpack.i.bf16 %v2809_v27, %v2754_v59  ;;  %v615_v33 = vld [vmem:[#allocation2 + $0x61] sm:$0xff] }
 0x12f   : > { %v2160_v15 = vpack.i.bf16 %v2798_v13, %v2736_v48  ;;  %v616_v16 = vld [vmem:[#allocation2 + $0x71] sm:$0xff]  ;;  %v2235_v35 = vpack.i.bf16 %v615_v33, %v2764_v63  ;;  %v631_v40 = vld [vmem:[#allocation2 + $0x62] sm:$0xff] }
 0x130   : > { %2021 = vrot.lane.b32.xlu1 %v2020_v36, %s2436_s8  ;;  %v2175_v18 = vpack.i.bf16 %v617_v17, %v616_v16  ;;  %v632_v19 = vld [vmem:[#allocation2 + $0x72] sm:$0xff]  ;;  %v625_v44 = vld [vmem:[#allocation2 + $0x121] sm:$0xff]  ;;  %v2210_v47 = vpack.i.bf16 %v616_v16, %v615_v33 }
 0x131   : > { %2056 = vrot.lane.b32.xlu0 %v2055_v37, %s2435_s9  ;;  %v682_v21 = vld [vmem:[#allocation2 + $0x92] sm:$0xff]  ;;  %v2180_v22 = vpack.i.bf16 %v633_v20, %v632_v19  ;;  %v609_v37 = vld [vmem:[#allocation2 + $0x120] sm:$0xff]  ;;  %v2215_v48 = vpack.i.bf16 %v632_v19, %v631_v40 }
 0x132   : > { %v2195_v24 = vpack.i.bf16 %v682_v21, %v633_v20  ;;  %v650_v26 = vld [vmem:[#allocation2 + $0x90] sm:$0xff]  ;;  %v2831_v51 = vld [vmem:[#allocation2 + $0x100] sm:$0xff] }
 0x133   : > { %v666_v32 = vld [vmem:[#allocation2 + $0x91] sm:$0xff] }
 0x134   : > { %2026 = vrot.lane.b32.xlu1 %v2025_v41, %s2434_s21  ;;  %v2190_v34 = vpack.i.bf16 %v666_v32, %v617_v17  ;;  %v2818_v36 = vld [vmem:[#allocation2 + $0x110] sm:$0xff] }
 0x135   : > { %2061 = vrot.lane.b32.xlu0 %v2060_v42, %s2436_s8  ;;  %v2200_v41 = vpack.i.bf16 %v609_v37, %v2818_v36  ;;  %v2240_v42 = vpack.i.bf16 %v631_v40, %v678_v8  ;;  %v624_v43 = vld [vmem:[#allocation2 + $0x111] sm:$0xff]  ;;  %v2290_v3 = vpack.i.bf16 %v2818_v36, %v2831_v51 }
 0x136   : > { %v658_v56 = vld [vmem:[#allocation2 + $0x130] sm:$0xff] }
 0x137   : > { %v674_v5 = vld [vmem:[#allocation2 + $0x131] sm:$0xff] }
 0x138   : > { %2031 = vrot.lane.b32.xlu1 %v2030_v45, %s2435_s9  ;;  %v2205_v45 = vpack.i.bf16 %v625_v44, %v624_v43 }
 0x139   : > { %2066 = vrot.lane.b32.xlu0 %v2065_v46, %s2437_s11  ;;  %v2245_v46 = vpack.i.bf16 %v2796_v11, %v2809_v27 }
 0x13c   : > { %2036 = vrot.lane.b32.xlu1 %v2035_v49, %s2436_s8  ;;  %v640_v49 = vld [vmem:[#allocation2 + $0x112] sm:$0xff] }
 0x13d   : > { %2071 = vrot.lane.b32.xlu0 %v2040_v28, %s2438_s18  ;;  %v2185_v28 = vpack.i.bf16 %v650_v26, %v601_v12 }
 0x140   : > { %2046 = vrot.lane.b32.xlu1 %v2045_v50, %s2432_s29 }
 0x141   : > { %2076 = vrot.lane.b32.xlu0 %v2045_v50, %s2439_s20  ;;  %v641_v50 = vld [vmem:[#allocation2 + $0x122] sm:$0xff] }
 0x144   : > { %2081 = vrot.lane.b32.xlu1 %v2080_v54, %s2433_s19 }
 0x145   : > { %2091 = vrot.lane.b32.xlu0 %v2090_v55, %s2434_s21  ;;  %v2275_v55 = vpack.i.bf16 %v2831_v51, %v2780_v4 }
 0x148   : > { %2086 = vrot.lane.b32.xlu1 %v2085_v57, %s2432_s29 }
 0x149   : > { %2096 = vrot.lane.b32.xlu0 %v2095_v58, %s2435_s9  ;;  %v2225_v58 = vpack.i.bf16 %v658_v56, %v609_v37 }
 0x14c   : > { %2121 = vrot.lane.b32.xlu1 %v2120_v61, %s2437_s11  ;;  %v639_v61 = vld [vmem:[#allocation2 + $0x102] sm:$0xff] }
 0x14d   : > { %2101 = vrot.lane.b32.xlu0 %v2100_v62, %s2436_s8  ;;  %v2285_v63 = vpack.i.bf16 %v639_v61, %v2798_v13  ;;  %v2265_v2 = vpack.i.bf16 %v640_v49, %v639_v61 }
 0x150   : > { %2126 = vrot.lane.b32.xlu1 %v2125_v0, %s2438_s18 }
 0x151   : > { %2106 = vrot.lane.b32.xlu0 %v2105_v1, %s2437_s11 }
 0x154   : > { %2131 = vrot.lane.b32.xlu1 %v2125_v0, %s2433_s19 }
 0x155   : > { %2111 = vrot.lane.b32.xlu0 %v2080_v54, %s2438_s18  ;;  %v2220_v54 = vpack.i.bf16 %v641_v50, %v640_v49 }
 0x158   : > { %2146 = vrot.lane.b32.xlu1 %v2145_v6, %s2437_s11  ;;  %v554_v6 = vld [vmem:[#allocation2 + $0xa0] sm:$0xff] }
 0x159   : > { %2116 = vrot.lane.b32.xlu0 %v2085_v57, %s2439_s20  ;;  %v623_v57 = vld [vmem:[#allocation2 + $0x101] sm:$0xff] }
 0x15a   : > { %v2280_v60 = vpack.i.bf16 %v623_v57, %v2788_v7  ;;  %v2260_v62 = vpack.i.bf16 %v624_v43, %v623_v57 }
 0x15c   : > { %2151 = vrot.lane.b32.xlu1 %v2150_v9, %s2438_s18 }
 0x15d   : > { %2136 = vrot.lane.b32.xlu0 %v2135_v10, %s2439_s20 }
 0x160   : > { %2156 = vrot.lane.b32.xlu1 %v2150_v9, %s2433_s19  ;;  %v2270_v9 = vpack.i.bf16 %v674_v5, %v625_v44 }
 0x161   : > { %2141 = vrot.lane.b32.xlu0 %v2135_v10, %s2432_s29 }
 0x164   : > { %2171 = vrot.lane.b32.xlu1 %v2170_v14, %s2434_s21 }
 0x165   : > { %2161 = vrot.lane.b32.xlu0 %v2160_v15, %s2439_s20 }
 0x168   : > { %2176 = vrot.lane.b32.xlu1 %v2175_v18, %s2435_s9 }
 0x169   : > { %2166 = vrot.lane.b32.xlu0 %v2160_v15, %s2432_s29  ;;  %v690_v15 = vld [vmem:[#allocation2 + $0x132] sm:$0xff] }
 0x16c   : > { %2181 = vrot.lane.b32.xlu1 %v2180_v22, %s2436_s8  ;;  %v2305_v22 = vpack.i.bf16 %v690_v15, %v641_v50 }
 0x16d   : > { %2196 = vrot.lane.b32.xlu0 %v2195_v24, %s2439_s20 }
 0x170   : > { %2186 = vrot.lane.b32.xlu1 %v2185_v28, %s2437_s11 }
 0x171   : > { %2231 = vrot.lane.b32.xlu0 %v2230_v29, %s2434_s21 }
 0x174   : > { %2191 = vrot.lane.b32.xlu1 %v2190_v34, %s2438_s18 }
 0x175   : > { %2236 = vrot.lane.b32.xlu0 %v2235_v35, %s2435_s9  ;;  %v546_v35 = vld [vmem:[#allocation2] sm:$0xff] }
 0x178   : > { %2201 = vrot.lane.b32.xlu1 %v2200_v41, %s2434_s21 }
 0x179   : > { %2241 = vrot.lane.b32.xlu0 %v2240_v42, %s2436_s8 }
 0x17c   : > { %2206 = vrot.lane.b32.xlu1 %v2205_v45, %s2435_s9 }
 0x17d   : > { %2246 = vrot.lane.b32.xlu0 %v2245_v46, %s2437_s11 }
 0x180   : > { %2211 = vrot.lane.b32.xlu1 %v2210_v47, %s2433_s19 }
 0x181   : > { %2251 = vrot.lane.b32.xlu0 %v2210_v47, %s2438_s18 }
 0x184   : > { %2216 = vrot.lane.b32.xlu1 %v2215_v48, %s2432_s29 }
 0x185   : > { %2256 = vrot.lane.b32.xlu0 %v2215_v48, %s2439_s20 }
 0x188   : > { %2221 = vrot.lane.b32.xlu1 %v2220_v54, %s2436_s8 }
 0x189   : > { %2276 = vrot.lane.b32.xlu0 %v2275_v55, %s2434_s21  ;;  %s2440_s21 = smov [#allocation6]  }
 0x18c   : > { %2226 = vrot.lane.b32.xlu1 %v2225_v58, %s2437_s11 }
 0x18d   : > { %2281 = vrot.lane.b32.xlu0 %v2280_v60, %s2435_s9  ;;  %s2364_s9 = sshll.u32 %s2440_s21, 4  ;;  %s2365_s9 = int_to_ptr.vmem [resolvable:$false] %s2364_s9 }
 0x190   : > { %2261 = vrot.lane.b32.xlu1 %v2260_v62, %s2433_s19  ;;  %s3195_s19 = scalar_lea.hbm %s3255_s7, %s1840_s23 }
 0x191   : > { %2286 = vrot.lane.b32.xlu0 %v2285_v63, %s2436_s8  ;;  %s2366_s8 = scalar_lea.vmem %s2365_s9, 4096 }
 0x192   : > { %v1997_v0 = vpop.permute.xlu1 %1996 }
 0x193   : > { %v1992_v1 = vpop.permute.xlu0 %1991  ;;  %v1999_v41 = vunpack.i.h.bf16 %v1997_v0  ;;  %v1998_v42 = vunpack.i.l.bf16 %v1997_v0 }
 0x194   : > { %2266 = vrot.lane.b32.xlu1 %v2265_v2, %s2432_s29  ;;  %v1994_v33 = vunpack.i.h.bf16 %v1992_v1  ;;  %v1993_v34 = vunpack.i.l.bf16 %v1992_v1 }
 0x195   : > { %2291 = vrot.lane.b32.xlu0 %v2290_v3, %s2437_s11 }
 0x196   : > { %v2002_v7 = vpop.permute.xlu1 %2001  ;;  %v1203_v43 = vsel %vm478_vm1, %v546_v35, %v1993_v34  ;;  %v1204_v44 = vsel %vm478_vm1, %v2714_v31, %v1994_v33 }
 0x197   : > { %v2007_v8 = vpop.permute.xlu0 %2006  ;;  %v2004_v10 = vunpack.i.h.bf16 %v2002_v7  ;;  %v2003_v12 = vunpack.i.l.bf16 %v2002_v7  ;;  %v1220_v56 = vsel %vm1219_vm4, %v1203_v43, %v1998_v42  ;;  %v1221_v57 = vsel %vm1219_vm4, %v1204_v44, %v1999_v41 }
 0x198   : > { %v2009_v13 = vunpack.i.h.bf16 %v2007_v8  ;;  %v2008_v14 = vunpack.i.l.bf16 %v2007_v8  ;;  %2271 = vrot.lane.b32.xlu1 %v2270_v9, %s2438_s18 }
 0x199   : > { %2296 = vrot.lane.b32.xlu0 %v2260_v62, %s2438_s18  ;;  %v1212_v16 = vsel %vm478_vm1, %v2743_v52, %v2004_v10  ;;  %v1211_v17 = vsel %vm478_vm1, %v554_v6, %v2003_v12  ;;  %s3263_s18 = sshll.u32 %s2586_s16, 7 }
 0x19a   : > { %v2855_v18 = vsel %vm1219_vm4, %v1212_v16, %v2009_v13  ;;  %v2858_v19 = vsel %vm1219_vm4, %v1211_v17, %v2008_v14  ;;  %v2860_v20 = vpop.permute.xlu1 %2011 }
 0x19b   : > { %v2862_v21 = vpop.permute.xlu0 %2041 }
 0x19c   : > { %2306 = vrot.lane.b32.xlu1 %v2305_v22, %s2439_s20  ;;  %v2043_v41 = vunpack.i.l.bf16 %v2862_v21 }
 0x19d   : > { %2301 = vrot.lane.b32.xlu0 %v2265_v2, %s2439_s20  ;;  %s3138_s20 = scalar_lea.vmem [#allocation6], %s3263_s18 }
 0x19e   : > { %v2866_v24 = vpop.permute.xlu1 %2016  ;;  %s1717_s22 = sshll.u32 %s3138_s20, 4  ;;  %s3199_s22 = int_to_ptr.vmem [resolvable:$true] %s1717_s22 }
 0x19f   : > { %v2052_v52 = vpop.permute.xlu0 %2051  ;;  %p2367_p8 = scmp.lt.s32.totalorder %s3199_s22, %s2365_s9 }
 0x1a0   : > { %v2054_v45 = vunpack.i.h.bf16 %v2052_v52  ;;  %v2053_v46 = vunpack.i.l.bf16 %v2052_v52 }
 0x1a2   : > { %v2868_v26 = vpop.permute.xlu1 %2021  ;;  %v1237_v31 = vsel %vm1236_vm5, %v1220_v56, %v2053_v46  ;;  %v1238_v61 = vsel %vm1236_vm5, %v1221_v57, %v2054_v45 }
 0x1a3   : > { %v2057_v28 = vpop.permute.xlu0 %2056 }
 0x1a4   : > { %v2059_v47 = vunpack.i.h.bf16 %v2057_v28  ;;  %v2058_v48 = vunpack.i.l.bf16 %v2057_v28 }
 0x1a6   : > { %v2870_v29 = vpop.permute.xlu1 %2026  ;;  %v1253_v0 = vsel %vm340_vm0, %v1237_v31, %v2058_v48  ;;  %v1254_v1 = vsel %vm340_vm0, %v1238_v61, %v2059_v47 }
 0x1a7   : > { %v2062_v32 = vpop.permute.xlu0 %2061  ;;  %v2029_v48 = vunpack.i.h.bf16 %v2870_v29 }
 0x1a8   : > { %v2064_v49 = vunpack.i.h.bf16 %v2062_v32  ;;  %v2063_v50 = vunpack.i.l.bf16 %v2062_v32 }
 0x1aa   : > { %v2872_v37 = vpop.permute.xlu1 %2031  ;;  %v1270_v2 = vsel %vm1269_vm6, %v1253_v0, %v2063_v50  ;;  %v1271_v3 = vsel %vm1269_vm6, %v1254_v1, %v2064_v49  ;;  %v2028_v49 = vunpack.i.l.bf16 %v2870_v29 }
 0x1ab   : > { %v2067_v40 = vpop.permute.xlu0 %2066  ;;  %v2034_v57 = vunpack.i.h.bf16 %v2872_v37 }
 0x1ac   : > { %v2069_v58 = vunpack.i.h.bf16 %v2067_v40  ;;  %v2068_v60 = vunpack.i.l.bf16 %v2067_v40  ;;  %v2044_v40 = vunpack.i.h.bf16 %v2862_v21 }
 0x1ae   : > { %v2877_v54 = vpop.permute.xlu1 %2036  ;;  %v1287_v7 = vsel %vm1286_vm7, %v1270_v2, %v2068_v60  ;;  %v1288_v8 = vsel %vm1286_vm7, %v1271_v3, %v2069_v58  ;;  %v2033_v58 = vunpack.i.l.bf16 %v2872_v37  ;;  %v1206_v2 = vsel %vm478_vm1, %v2704_v25, %v2044_v40 }
 0x1af   : > { %v2072_v55 = vpop.permute.xlu0 %2071  ;;  %v1205_v37 = vsel %vm478_vm1, %v2710_v30, %v2043_v41 }
 0x1b0   : > { %v2074_v62 = vunpack.i.h.bf16 %v2072_v55  ;;  %v2073_v63 = vunpack.i.l.bf16 %v2072_v55 }
 0x1b2   : > { %v2047_v5 = vpop.permute.xlu1 %2046  ;;  %v1304_v12 = vsel %vm1303_vm8, %v1287_v7, %v2073_v63  ;;  %v1305_v13 = vsel %vm1303_vm8, %v1288_v8, %v2074_v62  ;;  %v2039_v62 = vunpack.i.h.bf16 %v2877_v54  ;;  %v2038_v63 = vunpack.i.l.bf16 %v2877_v54 }
 0x1b3   : > { %v2077_v6 = vpop.permute.xlu0 %2076  ;;  %v2049_v61 = vunpack.i.h.bf16 %v2047_v5 }
 0x1b4   : > { %v2079_v9 = vunpack.i.h.bf16 %v2077_v6  ;;  %v2078_v10 = vunpack.i.l.bf16 %v2077_v6 }
 0x1b5   : > { %v1223_v54 = vsel %vm1219_vm4, %v1206_v2, %v2049_v61 }
 0x1b6   : > { %v1321_v14 = vsel %vm1320_vm9, %v1304_v12, %v2078_v10  ;;  %v1322_v15 = vsel %vm1320_vm9, %v1305_v13, %v2079_v9  ;;  %v2082_v17 = vpop.permute.xlu1 %2081  ;;  %v2014_v9 = vunpack.i.h.bf16 %v2860_v20  ;;  %v2013_v10 = vunpack.i.l.bf16 %v2860_v20 }
 0x1b7   : > { %v1337_v16 = vpack.c.bf16 %v1322_v15, %v1321_v14  ;;  %v2092_v22 = vpop.permute.xlu0 %2091  ;;  %v2084_v32 = vunpack.i.h.bf16 %v2082_v17  ;;  %v2083_v33 = vunpack.i.l.bf16 %v2082_v17  ;;  %v2018_v17 = vunpack.i.l.bf16 %v2866_v24 }
 0x1b8   : > { %v2094_v52 = vunpack.i.h.bf16 %v2092_v22  ;;  %v2093_v28 = vunpack.i.l.bf16 %v2092_v22  ;;  %v1240_v25 = vsel %vm1236_vm5, %v1223_v54, %v2014_v9  ;;  %v2023_v20 = vunpack.i.l.bf16 %v2868_v26 }
 0x1b9   : > { %1894 = vmatprep.mubr.msk.bf16.mxu1 %vm1372_vm10, %v1337_v16  ;;  %v2019_v16 = vunpack.i.h.bf16 %v2866_v24 }
 0x1ba   : > { %v1245_v34 = vsel %vm1236_vm5, %v2858_v19, %v2093_v28  ;;  %v1246_v35 = vsel %vm1236_vm5, %v2855_v18, %v2094_v52  ;;  %v2087_v42 = vpop.permute.xlu1 %2086  ;;  %v1214_v19 = vsel %vm478_vm1, %v2724_v38, %v2084_v32  ;;  %v1213_v18 = vsel %vm478_vm1, %v2745_v53, %v2083_v33 }
 0x1bb   : > { %v2097_v43 = vpop.permute.xlu0 %2096  ;;  %v2089_v44 = vunpack.i.h.bf16 %v2087_v42  ;;  %v2088_v45 = vunpack.i.l.bf16 %v2087_v42  ;;  %v2048_v53 = vunpack.i.l.bf16 %v2047_v5  ;;  %v2024_v33 = vunpack.i.h.bf16 %v2868_v26 }
 0x1bc   : > { %v2099_v46 = vunpack.i.h.bf16 %v2097_v43  ;;  %v2098_v47 = vunpack.i.l.bf16 %v2097_v43 }
 0x1bd   : > { %v1230_v50 = vsel %vm1219_vm4, %v1213_v18, %v2088_v45  ;;  %v1231_v21 = vsel %vm1219_vm4, %v1214_v19, %v2089_v44  ;;  %v1222_v8 = vsel %vm1219_vm4, %v1205_v37, %v2048_v53 }
 0x1be   : > { %v1261_v55 = vsel %vm340_vm0, %v1245_v34, %v2098_v47  ;;  %v1262_v56 = vsel %vm340_vm0, %v1246_v35, %v2099_v46  ;;  %v1247_v29 = vsel %vm1236_vm5, %v1230_v50, %v2028_v49  ;;  %v1248_v60 = vsel %vm1236_vm5, %v1231_v21, %v2029_v48  ;;  %v2122_v38 = vpop.permute.xlu1 %2121 }
 0x1bf   : > { %v2102_v31 = vpop.permute.xlu0 %2101  ;;  %v1263_v0 = vsel %vm340_vm0, %v1247_v29, %v2033_v58  ;;  %v1264_v1 = vsel %vm340_vm0, %v1248_v60, %v2034_v57  ;;  %v1239_v12 = vsel %vm1236_vm5, %v1222_v8, %v2013_v10  ;;  %v1256_v35 = vsel %vm340_vm0, %v1240_v25, %v2019_v16 }
 0x1c0   : > { %v1280_v7 = vsel %vm1269_vm6, %v1263_v0, %v2038_v63  ;;  %v1281_v5 = vsel %vm1269_vm6, %v1264_v1, %v2039_v62  ;;  %v2104_v13 = vunpack.i.h.bf16 %v2102_v31  ;;  %v2103_v30 = vunpack.i.l.bf16 %v2102_v31 }
 0x1c1   : > { %v1255_v34 = vsel %vm340_vm0, %v1239_v12, %v2018_v17  ;;  %v2124_v40 = vunpack.i.h.bf16 %v2122_v38  ;;  %v2123_v41 = vunpack.i.l.bf16 %v2122_v38 }
 0x1c2   : > { %v2127_v3 = vpop.permute.xlu1 %2126  ;;  %v1278_v42 = vsel %vm1269_vm6, %v1261_v55, %v2103_v30  ;;  %v1279_v43 = vsel %vm1269_vm6, %v1262_v56, %v2104_v13  ;;  %v1272_v55 = vsel %vm1269_vm6, %v1255_v34, %v2023_v20  ;;  %v1273_v56 = vsel %vm1269_vm6, %v1256_v35, %v2024_v33 }
 0x1c3   : > { %v2107_v6 = vpop.permute.xlu0 %2106  ;;  %v2129_v49 = vunpack.i.h.bf16 %v2127_v3  ;;  %v2128_v26 = vunpack.i.l.bf16 %v2127_v3  ;;  %v1289_v60 = vsel %vm1286_vm7, %v1272_v55, %v2123_v41  ;;  %v1290_v38 = vsel %vm1286_vm7, %v1273_v56, %v2124_v40 }
 0x1c4   : > { %v2109_v22 = vunpack.i.h.bf16 %v2107_v6  ;;  %v2108_v52 = vunpack.i.l.bf16 %v2107_v6 }
 0x1c5   : > { %v1306_v53 = vsel %vm1303_vm8, %v1289_v60, %v2128_v26  ;;  %v1307_v62 = vsel %vm1303_vm8, %v1290_v38, %v2129_v49 }
 0x1c6   : > { %v2930_v14 = vpop.permute.xlu1 %2131  ;;  %v1295_v45 = vsel %vm1286_vm7, %v1278_v42, %v2108_v52  ;;  %v1296_v46 = vsel %vm1286_vm7, %v1279_v43, %v2109_v22 }
 0x1c7   : > { %v2112_v15 = vpop.permute.xlu0 %2111  ;;  %v2134_v42 = vunpack.i.h.bf16 %v2930_v14  ;;  %v2133_v43 = vunpack.i.l.bf16 %v2930_v14 }
 0x1c8   : > { %v2114_v28 = vunpack.i.h.bf16 %v2112_v15  ;;  %v2113_v32 = vunpack.i.l.bf16 %v2112_v15 }
 0x1ca   : > { %v2147_v44 = vpop.permute.xlu1 %2146  ;;  %v1312_v19 = vsel %vm1303_vm8, %v1295_v45, %v2113_v32  ;;  %v1313_v18 = vsel %vm1303_vm8, %v1296_v46, %v2114_v28 }
 0x1cb   : > { %v2117_v24 = vpop.permute.xlu0 %2116  ;;  %v2149_v3 = vunpack.i.h.bf16 %v2147_v44  ;;  %v2148_v6 = vunpack.i.l.bf16 %v2147_v44 }
 0x1cc   : > { %v2119_v47 = vunpack.i.h.bf16 %v2117_v24  ;;  %v2118_v48 = vunpack.i.l.bf16 %v2117_v24 }
 0x1cd   : > { %v1297_v12 = vsel %vm1286_vm7, %v1280_v7, %v2148_v6  ;;  %v1298_v25 = vsel %vm1286_vm7, %v1281_v5, %v2149_v3 }
 0x1ce   : > { %v2945_v50 = vsel %vm1320_vm9, %v1312_v19, %v2118_v48  ;;  %v2948_v21 = vsel %vm1320_vm9, %v1313_v18, %v2119_v47  ;;  %v2152_v58 = vpop.permute.xlu1 %2151  ;;  %v1208_v19 = vsel %vm478_vm1, %v2754_v59, %v2134_v42  ;;  %v1207_v18 = vsel %vm478_vm1, %v2700_v23, %v2133_v43 }
 0x1cf   : > { %v1341_v57 = vpack.c.bf16 %v2948_v21, %v2945_v50  ;;  %v2137_v29 = vpop.permute.xlu0 %2136  ;;  %v2154_v8 = vunpack.i.h.bf16 %v2152_v58  ;;  %v2153_v54 = vunpack.i.l.bf16 %v2152_v58 }
 0x1d0   : > { %v2139_v31 = vunpack.i.h.bf16 %v2137_v29  ;;  %v2138_v61 = vunpack.i.l.bf16 %v2137_v29 }
 0x1d1   : > { %v1314_v15 = vsel %vm1303_vm8, %v1297_v12, %v2153_v54  ;;  %v1315_v16 = vsel %vm1303_vm8, %v1298_v25, %v2154_v8 }
 0x1d2   : > { %v1323_v63 = vsel %vm1320_vm9, %v1306_v53, %v2138_v61  ;;  %v1324_v0 = vsel %vm1320_vm9, %v1307_v62, %v2139_v31  ;;  %v2960_v2 = vpop.permute.xlu1 %2156 }
 0x1d3   : > { %v1338_v1 = vpack.c.bf16 %v1324_v0, %v1323_v63  ;;  %v2142_v37 = vpop.permute.xlu0 %2141 }
 0x1d4   : > { %v2144_v44 = vunpack.i.h.bf16 %v2142_v37  ;;  %v2143_v24 = vunpack.i.l.bf16 %v2142_v37 }
 0x1d5   : > { %1895 = vmatmul.mubr.msk.bf16.vlgmr.msra.gmra.mrb[8].mxu1 %vm1372_vm10, %v1338_v1 }
 0x1d6   : > { %v2963_v9 = vpop.permute.xlu1 %2171  ;;  %v1225_v55 = vsel %vm1219_vm4, %v1208_v19, %v2144_v44  ;;  %v1224_v56 = vsel %vm1219_vm4, %v1207_v18, %v2143_v24 }
 0x1d7   : > { %v2162_v10 = vpop.permute.xlu0 %2161  ;;  %v2174_v62 = vunpack.i.h.bf16 %v2963_v9  ;;  %v2173_v3 = vunpack.i.l.bf16 %v2963_v9 }
 0x1d8   : > { %v2164_v13 = vunpack.i.h.bf16 %v2162_v10  ;;  %v2163_v30 = vunpack.i.l.bf16 %v2162_v10 }
 0x1da   : > { %v2970_v17 = vsel %vm1320_vm9, %v1315_v16, %v2164_v13  ;;  %v2973_v22 = vsel %vm1320_vm9, %v1314_v15, %v2163_v30  ;;  %v2977_v28 = vpop.permute.xlu1 %2176 }
 0x1db   : > { %v1342_v52 = vpack.c.bf16 %v2970_v17, %v2973_v22  ;;  %v2979_v7 = vpop.permute.xlu0 %2166  ;;  %v2179_v6 = vunpack.i.h.bf16 %v2977_v28  ;;  %v2178_v10 = vunpack.i.l.bf16 %v2977_v28 }
 0x1de   : > { %v2981_v5 = vpop.permute.xlu1 %2181 }
 0x1df   : > { %v2983_v32 = vpop.permute.xlu0 %2196  ;;  %v2184_v12 = vunpack.i.h.bf16 %v2981_v5 }
 0x1e2   : > { %v2985_v33 = vpop.permute.xlu1 %2186 }
 0x1e3   : > { %v2232_v20 = vpop.permute.xlu0 %2231  ;;  %v2189_v18 = vunpack.i.h.bf16 %v2985_v33 }
 0x1e4   : > { %v2234_v45 = vunpack.i.h.bf16 %v2232_v20  ;;  %v2233_v46 = vunpack.i.l.bf16 %v2232_v20 }
 0x1e6   : > { %v2987_v34 = vpop.permute.xlu1 %2191  ;;  %v1241_v29 = vsel %vm1236_vm5, %v1224_v56, %v2233_v46  ;;  %v1242_v60 = vsel %vm1236_vm5, %v1225_v55, %v2234_v45  ;;  %v2188_v55 = vunpack.i.l.bf16 %v2985_v33 }
 0x1e7   : > { %v2237_v35 = vpop.permute.xlu0 %2236 }
 0x1e8   : > { %v2239_v49 = vunpack.i.h.bf16 %v2237_v35  ;;  %v2238_v26 = vunpack.i.l.bf16 %v2237_v35 }
 0x1ea   : > { %v2989_v40 = vpop.permute.xlu1 %2201  ;;  %v1257_v59 = vsel %vm340_vm0, %v1241_v29, %v2238_v26  ;;  %v1258_v23 = vsel %vm340_vm0, %v1242_v60, %v2239_v49 }
 0x1eb   : > { %v2242_v41 = vpop.permute.xlu0 %2241 }
 0x1ec   : > { %v2244_v14 = vunpack.i.h.bf16 %v2242_v41  ;;  %v2243_v58 = vunpack.i.l.bf16 %v2242_v41 }
 0x1ee   : > { %v2993_v47 = vpop.permute.xlu1 %2206  ;;  %v1274_v8 = vsel %vm1269_vm6, %v1257_v59, %v2243_v58  ;;  %v1275_v54 = vsel %vm1269_vm6, %v1258_v23, %v2244_v14  ;;  %v2194_v58 = vunpack.i.h.bf16 %v2987_v34 }
 0x1ef   : > { %v2247_v48 = vpop.permute.xlu0 %2246 }
 0x1f0   : > { %v2249_v38 = vunpack.i.h.bf16 %v2247_v48  ;;  %v2248_v31 = vunpack.i.l.bf16 %v2247_v48  ;;  %v2183_v48 = vunpack.i.l.bf16 %v2981_v5  ;;  %v2193_v5 = vunpack.i.l.bf16 %v2987_v34 }
 0x1f2   : > { %v2212_v61 = vpop.permute.xlu1 %2211  ;;  %v1291_v25 = vsel %vm1286_vm7, %v1274_v8, %v2248_v31  ;;  %v1292_v13 = vsel %vm1286_vm7, %v1275_v54, %v2249_v38  ;;  %v2159_v38 = vunpack.i.h.bf16 %v2960_v2  ;;  %v2158_v31 = vunpack.i.l.bf16 %v2960_v2 }
 0x1f3   : > { %v2252_v53 = vpop.permute.xlu0 %2251  ;;  %v2214_v63 = vunpack.i.h.bf16 %v2212_v61  ;;  %v2213_v0 = vunpack.i.l.bf16 %v2212_v61 }
 0x1f4   : > { %v2254_v1 = vunpack.i.h.bf16 %v2252_v53  ;;  %v2253_v37 = vunpack.i.l.bf16 %v2252_v53  ;;  %v2199_v53 = vunpack.i.h.bf16 %v2983_v32 }
 0x1f5   : > { %v1210_v41 = vsel %vm478_vm1, %v2796_v11, %v2214_v63  ;;  %v1209_v42 = vsel %vm478_vm1, %v2809_v27, %v2213_v0  ;;  %v2169_v0 = vunpack.i.h.bf16 %v2979_v7 }
 0x1f6   : > { %v2217_v30 = vpop.permute.xlu1 %2216  ;;  %v1308_v28 = vsel %vm1303_vm8, %v1291_v25, %v2253_v37  ;;  %v1309_v43 = vsel %vm1303_vm8, %v1292_v13, %v2254_v1  ;;  %v2168_v1 = vunpack.i.l.bf16 %v2979_v7 }
 0x1f7   : > { %v2257_v15 = vpop.permute.xlu0 %2256  ;;  %v2219_v16 = vunpack.i.h.bf16 %v2217_v30  ;;  %v2218_v20 = vunpack.i.l.bf16 %v2217_v30 }
 0x1f8   : > { %v2259_v35 = vunpack.i.h.bf16 %v2257_v15  ;;  %v2258_v9 = vunpack.i.l.bf16 %v2257_v15 }
 0x1f9   : > { %v1226_v44 = vsel %vm1219_vm4, %v1209_v42, %v2218_v20  ;;  %v1227_v24 = vsel %vm1219_vm4, %v1210_v41, %v2219_v16  ;;  %v2209_v20 = vunpack.i.h.bf16 %v2993_v47 }
 0x1fa   : > { %v1325_v45 = vsel %vm1320_vm9, %v1308_v28, %v2258_v9  ;;  %v1326_v46 = vsel %vm1320_vm9, %v1309_v43, %v2259_v35  ;;  %v1243_v49 = vsel %vm1236_vm5, %v1226_v44, %v2173_v3  ;;  %v1244_v11 = vsel %vm1236_vm5, %v1227_v24, %v2174_v62  ;;  %v3027_v27 = vpop.permute.xlu1 %2221 }
 0x1fb   : > { %v1339_v26 = vpack.c.bf16 %v1326_v46, %v1325_v45  ;;  %v2277_v19 = vpop.permute.xlu0 %2276  ;;  %v1259_v56 = vsel %vm340_vm0, %v1243_v49, %v2178_v10  ;;  %v1260_v14 = vsel %vm340_vm0, %v1244_v11, %v2179_v6  ;;  %v2198_v62 = vunpack.i.l.bf16 %v2983_v32 }
 0x1fc   : > { %v1276_v29 = vsel %vm1269_vm6, %v1259_v56, %v2183_v48  ;;  %v1277_v60 = vsel %vm1269_vm6, %v1260_v14, %v2184_v12  ;;  %v1216_v6 = vsel %vm478_vm1, %v2780_v4, %v2159_v38  ;;  %v1215_v32 = vsel %vm478_vm1, %v2726_v39, %v2158_v31 }
 0x1fd   : > { %1898 = vmatprep.mubr.msk.bf16.mxu1 %vm1372_vm10, %v1339_v26  ;;  %v1293_v33 = vsel %vm1286_vm7, %v1276_v29, %v2188_v55  ;;  %v1294_v61 = vsel %vm1286_vm7, %v1277_v60, %v2189_v18  ;;  %v2279_v8 = vunpack.i.h.bf16 %v2277_v19  ;;  %v2278_v54 = vunpack.i.l.bf16 %v2277_v19 }
 0x1fe   : > { %v3044_v59 = vpop.permute.xlu1 %2226  ;;  %v1310_v23 = vsel %vm1303_vm8, %v1293_v33, %v2193_v5  ;;  %v1311_v63 = vsel %vm1303_vm8, %v1294_v61, %v2194_v58  ;;  %v1233_v25 = vsel %vm1219_vm4, %v1216_v6, %v2169_v0  ;;  %v1232_v13 = vsel %vm1219_vm4, %v1215_v32, %v2168_v1 }
 0x1ff   : > { %v2282_v34 = vpop.permute.xlu0 %2281  ;;  %v1327_v2 = vsel %vm1320_vm9, %v1310_v23, %v2198_v62  ;;  %v1328_v37 = vsel %vm1320_vm9, %v1311_v63, %v2199_v53  ;;  %v2204_v39 = vunpack.i.h.bf16 %v2989_v40  ;;  %v2203_v4 = vunpack.i.l.bf16 %v2989_v40 }
 0x200   : > { %v1340_v3 = vpack.c.bf16 %v1328_v37, %v1327_v2  ;;  %v2284_v7 = vunpack.i.h.bf16 %v2282_v34  ;;  %v2283_v30 = vunpack.i.l.bf16 %v2282_v34  ;;  %v2208_v35 = vunpack.i.l.bf16 %v2993_v47 }
 0x201   : > { %v2224_v9 = vunpack.i.h.bf16 %v3027_v27  ;;  %v2223_v41 = vunpack.i.l.bf16 %v3027_v27  ;;  %v1249_v42 = vsel %vm1236_vm5, %v1232_v13, %v2278_v54  ;;  %v1250_v28 = vsel %vm1236_vm5, %v1233_v25, %v2279_v8  ;;  %v1522_v25 = vld [vmem:[%s3253_s5] sm:$0x3] }
 0x202   : > { %v2262_v10 = vpop.permute.xlu1 %2261  ;;  %1899 = vmatmul.mubr.msk.bf16.gmra.mrb[12].mxu1 %vm1372_vm10, %v1340_v3  ;;  %v2229_v21 = vunpack.i.h.bf16 %v3044_v59  ;;  %v1265_v24 = vsel %vm340_vm0, %v1249_v42, %v2283_v30  ;;  %v1266_v47 = vsel %vm340_vm0, %v1250_v28, %v2284_v7  ;;  %1931 = vmatprep.subr.msk.bf16.mxu0 %vm1397_vm3, %v1522_v25  ;;  %v1555_v13 = vsel %vm1397_vm3, %v1522_v25, 0  ;;  %v1810_v7 = vld [vmem:[%s3252_s4] ss:$0 sm:$0xff] }
 0x203   : > { %v2287_v12 = vpop.permute.xlu0 %2286  ;;  %v2264_v15 = vunpack.i.h.bf16 %v2262_v10  ;;  %v2263_v16 = vunpack.i.l.bf16 %v2262_v10  ;;  %1902 = vmatprep.mubr.msk.bf16.mxu1 %vm1372_vm10, %v1341_v57  ;;  %v2228_v57 = vunpack.i.l.bf16 %v3044_v59  ;;  %1911 = vmatpush3.bf16.msra.mxu0 %v1555_v13  ;;  %v2314_v13 = vld [vmem:[%s2592_s15 + $0x10] sm:$0xff] }
 0x204   : > { %v2289_v48 = vunpack.i.h.bf16 %v2287_v12  ;;  %v2288_v49 = vunpack.i.l.bf16 %v2287_v12 }
 0x205   : > { %v1218_v45 = vsel %vm478_vm1, %v2818_v36, %v2264_v15  ;;  %v1217_v46 = vsel %vm478_vm1, %v2831_v51, %v2263_v16 }
 0x206   : > { %v2267_v43 = vpop.permute.xlu1 %2266  ;;  %v1282_v33 = vsel %vm1269_vm6, %v1265_v24, %v2288_v49  ;;  %v1283_v61 = vsel %vm1269_vm6, %v1266_v47, %v2289_v48 }
 0x207   : > { %v2292_v50 = vpop.permute.xlu0 %2291  ;;  %v2269_v44 = vunpack.i.h.bf16 %v2267_v43  ;;  %v2268_v40 = vunpack.i.l.bf16 %v2267_v43 }
 0x208   : > { %v2294_v18 = vunpack.i.h.bf16 %v2292_v50  ;;  %v2293_v55 = vunpack.i.l.bf16 %v2292_v50 }
 0x209   : > { %v1234_v11 = vsel %vm1219_vm4, %v1217_v46, %v2268_v40  ;;  %v1235_v26 = vsel %vm1219_vm4, %v1218_v45, %v2269_v44 }
 0x20a   : > { %v1251_v27 = vsel %vm1236_vm5, %v1234_v11, %v2203_v4  ;;  %v1252_v19 = vsel %vm1236_vm5, %v1235_v26, %v2204_v39  ;;  %v2272_v56 = vpop.permute.xlu1 %2271  ;;  %1903 = vmatmul.mubr.msk.bf16.gmra.mrb[16].mxu1 %vm1372_vm10, %v1342_v52  ;;  %v1299_v59 = vsel %vm1286_vm7, %v1282_v33, %v2293_v55  ;;  %v1300_v17 = vsel %vm1286_vm7, %v1283_v61, %v2294_v18 }
 0x20b   : > { %v2297_v14 = vpop.permute.xlu0 %2296  ;;  %v1267_v58 = vsel %vm340_vm0, %v1251_v27, %v2208_v35  ;;  %v1268_v36 = vsel %vm340_vm0, %v1252_v19, %v2209_v20  ;;  %v2274_v5 = vunpack.i.h.bf16 %v2272_v56  ;;  %v2273_v51 = vunpack.i.l.bf16 %v2272_v56 }
 0x20c   : > { %v1284_v29 = vsel %vm1269_vm6, %v1267_v58, %v2223_v41  ;;  %v1285_v60 = vsel %vm1269_vm6, %v1268_v36, %v2224_v9  ;;  %v2299_v38 = vunpack.i.h.bf16 %v2297_v14  ;;  %v2298_v31 = vunpack.i.l.bf16 %v2297_v14 }
 0x20d   : > { %v1301_v53 = vsel %vm1286_vm7, %v1284_v29, %v2228_v57  ;;  %v1302_v62 = vsel %vm1286_vm7, %v1285_v60, %v2229_v21 }
 0x20e   : > { %v2307_v22 = vpop.permute.xlu1 %2306  ;;  %v1318_v1 = vsel %vm1303_vm8, %v1301_v53, %v2273_v51  ;;  %v1319_v2 = vsel %vm1303_vm8, %v1302_v62, %v2274_v5  ;;  %v1316_v37 = vsel %vm1303_vm8, %v1299_v59, %v2298_v31  ;;  %v1317_v3 = vsel %vm1303_vm8, %v1300_v17, %v2299_v38 }
 0x20f   : > { %v2302_v52 = vpop.permute.xlu0 %2301  ;;  %v2309_v34 = vunpack.i.h.bf16 %v2307_v22  ;;  %v2308_v23 = vunpack.i.l.bf16 %v2307_v22 }
 0x210   : > { %v2304_v63 = vunpack.i.h.bf16 %v2302_v52  ;;  %v2303_v0 = vunpack.i.l.bf16 %v2302_v52 }
 0x211   : > { %v1335_v6 = vsel %vm1320_vm9, %v1318_v1, %v2308_v23  ;;  %v1336_v32 = vsel %vm1320_vm9, %v1319_v2, %v2309_v34 }
 0x212   : > { %v1333_v8 = vsel %vm1320_vm9, %v1316_v37, %v2303_v0  ;;  %v1334_v54 = vsel %vm1320_vm9, %v1317_v3, %v2304_v63  ;;  %v1344_v10 = vpack.c.bf16 %v1336_v32, %v1335_v6  ;;  %v3126_v32 = vld [vmem:[%s3254_s6] ss:$0 sm:$0xff] }
 0x213   : > { %v1343_v12 = vpack.c.bf16 %v1334_v54, %v1333_v8 }
 0x215   : > { %1906 = vmatprep.mubr.msk.bf16.mxu1 %vm1372_vm10, %v1343_v12 }
 0x216   : > { %1907 = vmatmul.mubr.msk.bf16.gmra.mrb[20].mxu1 %vm1372_vm10, %v1344_v10 }
 0x2a8   : > { %v1896_v30 = vpop.f32.mrb[8].mxu1 }
 0x2a9   : > { %v1444_v15 = vadd.f32 %v1896_v30, %v1810_v7  ;;  %v1435_v16 = vpop.f32.mrb[9].mxu1 }
 0x2aa   : > { %v1436_v39 = vadd.f32 %v1810_v7, %v1435_v16  ;;  %v1897_v4 = vpop.f32.mrb[10].mxu1  ;;  %v2315_v16 = vld [vmem:[%s2592_s15] sm:$0xff] }
 0x2ab   : > { %v1447_v20 = vadd.f32 %v1897_v4, %v1810_v7  ;;  %v1438_v35 = vpop.f32.mrb[11].mxu1  ;;  %v1500_v41 = vmax.f32 %v1444_v15, 0.0 }
 0x2ac   : > { %v1439_v9 = vadd.f32 %v1810_v7, %v1438_v35  ;;  %v1498_v28 = vmax.f32 %v1436_v39, 0.0  ;;  %v2316_v35 = vld [vmem:[%s2592_s15 + $0x18] sm:$0xff] }
 0x2ad   : > { %v1501_v42 = vmax.f32 %v1447_v20, 0.0 }
 0x2ae   : > { %v1499_v43 = vmax.f32 %v1439_v9, 0.0 }
 0x2af   : > { %v1515_v50 = vpack.c.bf16 %v1501_v42, %v1500_v41  ;;  %v2317_v42 = vld [vmem:[%s2592_s15 + $0x8] sm:$0xff] }
 0x2b0   : > { %v1514_v21 = vpack.c.bf16 %v1499_v43, %v1498_v28 }
 0x2b2   : > { %1912 = vmatprep.mubr.msk.bf16.mxu0 %vm478_vm1, %v1514_v21 }
 0x2b3   : > { %1913 = vmatmul.mubr.msk.bf16.vlgmr.msra.gmra.mrb[8].mxu0 %vm478_vm1, %v1515_v50 }
 0x2d5   : > { %v1900_v57 = vpop.f32.mrb[12].mxu1 }
 0x2d6   : > { %v1460_v44 = vadd.f32 %v1900_v57, %v1810_v7  ;;  %v1451_v40 = vpop.f32.mrb[13].mxu1 }
 0x2d7   : > { %v1452_v24 = vadd.f32 %v1810_v7, %v1451_v40  ;;  %v1901_v47 = vpop.f32.mrb[14].mxu1 }
 0x2d8   : > { %v1463_v45 = vadd.f32 %v1901_v47, %v1810_v7  ;;  %v1454_v46 = vpop.f32.mrb[15].mxu1  ;;  %v1504_v49 = vmax.f32 %v1460_v44, 0.0  ;;  %v2318_v47 = vld [vmem:[%s2592_s15 + $0x30] sm:$0xff] }
 0x2d9   : > { %v1455_v48 = vadd.f32 %v1810_v7, %v1454_v46  ;;  %v1502_v26 = vmax.f32 %v1452_v24, 0.0 }
 0x2da   : > { %v1505_v11 = vmax.f32 %v1463_v45, 0.0 }
 0x2db   : > { %v1503_v27 = vmax.f32 %v1455_v48, 0.0 }
 0x2dc   : > { %v1517_v19 = vpack.c.bf16 %v1505_v11, %v1504_v49  ;;  %v2319_v49 = vld [vmem:[%s2592_s15 + $0x20] sm:$0xff] }
 0x2dd   : > { %v1516_v18 = vpack.c.bf16 %v1503_v27, %v1502_v26  ;;  %v1904_v55 = vpop.f32.mrb[16].mxu1 }
 0x2de   : > { %v1476_v56 = vadd.f32 %v1904_v55, %v1810_v7  ;;  %v1467_v14 = vpop.f32.mrb[17].mxu1 }
 0x2df   : > { %v1468_v58 = vadd.f32 %v1810_v7, %v1467_v14  ;;  %v1905_v36 = vpop.f32.mrb[18].mxu1  ;;  %1916 = vmatprep.mubr.msk.bf16.mxu0 %vm478_vm1, %v1516_v18 }
 0x2e0   : > { %v1479_v5 = vadd.f32 %v1905_v36, %v1810_v7  ;;  %v1470_v51 = vpop.f32.mrb[19].mxu1  ;;  %1917 = vmatmul.mubr.msk.bf16.gmra.mrb[12].mxu0 %vm478_vm1, %v1517_v19  ;;  %v1508_v60 = vmax.f32 %v1476_v56, 0.0  ;;  %v2320_v19 = vld [vmem:[%s2592_s15 + $0x38] sm:$0xff]  ;;  %v2321_v56 = vld [vmem:[%s2592_s15 + $0x28] sm:$0xff] }
 0x2e1   : > { %v1471_v29 = vadd.f32 %v1810_v7, %v1470_v51  ;;  %v1506_v31 = vmax.f32 %v1468_v58, 0.0 }
 0x2e2   : > { %v1509_v38 = vmax.f32 %v1479_v5, 0.0 }
 0x2e3   : > { %v1507_v33 = vmax.f32 %v1471_v29, 0.0 }
 0x2e4   : > { %v1519_v61 = vpack.c.bf16 %v1509_v38, %v1508_v60 }
 0x2e5   : > { %v1518_v53 = vpack.c.bf16 %v1507_v33, %v1506_v31  ;;  %v2322_v31 = vld [vmem:[%s2592_s15 + $0x50] sm:$0xff] }
 0x2e7   : > { %1920 = vmatprep.mubr.msk.bf16.mxu0 %vm478_vm1, %v1518_v53 }
 0x2e8   : > { %1921 = vmatmul.mubr.msk.bf16.gmra.mrb[16].mxu0 %vm478_vm1, %v1519_v61 }
 0x2e9   : > { %v1908_v62 = vpop.f32.mrb[20].mxu1 }
 0x2ea   : > { %v1492_v59 = vadd.f32 %v1908_v62, %v1810_v7  ;;  %v1483_v17 = vpop.f32.mrb[21].mxu1  ;;  %v2323_v62 = vld [vmem:[%s2592_s15 + $0x40] sm:$0xff] }
 0x2eb   : > { %v1484_v22 = vadd.f32 %v1810_v7, %v1483_v17  ;;  %v1909_v52 = vpop.f32.mrb[22].mxu1 }
 0x2ec   : > { %v1495_v34 = vadd.f32 %v1909_v52, %v1810_v7  ;;  %v1486_v23 = vpop.f32.mrb[23].mxu1  ;;  %v1512_v0 = vmax.f32 %v1492_v59, 0.0  ;;  %v2324_v52 = vld [vmem:[%s2592_s15 + $0x58] sm:$0xff] }
 0x2ed   : > { %v1487_v63 = vadd.f32 %v1810_v7, %v1486_v23  ;;  %v1510_v2 = vmax.f32 %v1484_v22, 0.0 }
 0x2ee   : > { %v1513_v1 = vmax.f32 %v1495_v34, 0.0 }
 0x2ef   : > { %v1511_v37 = vmax.f32 %v1487_v63, 0.0  ;;  %v2325_v63 = vld [vmem:[%s2592_s15 + $0x48] sm:$0xff] }
 0x2f0   : > { %v1521_v3 = vpack.c.bf16 %v1513_v1, %v1512_v0 }
 0x2f1   : > { %v1520_v6 = vpack.c.bf16 %v1511_v37, %v1510_v2 }
 0x2f3   : > { %1924 = vmatprep.mubr.msk.bf16.mxu0 %vm478_vm1, %v1520_v6 }
 0x2f4   : > { %1925 = vmatmul.mubr.msk.bf16.gmra.mrb[20].mxu0 %vm478_vm1, %v1521_v3 }
 0x386   : > { %v1914_v8 = vpop.f32.mrb[8].mxu0 }
 0x387   : > { %v1600_v54 = vadd.f32 %v1914_v8, %v3126_v32  ;;  %v1591_v10 = vpop.f32.mrb[9].mxu0 }
 0x388   : > { %v1592_v12 = vadd.f32 %v3126_v32, %v1591_v10  ;;  %v1915_v25 = vpop.f32.mrb[10].mxu0  ;;  %v2326_v10 = vld [vmem:[%s2592_s15 + $0x70] sm:$0xff] }
 0x389   : > { %v1656_v7 = vadd.f32 %v2314_v13, %v1600_v54  ;;  %v1603_v30 = vadd.f32 %v1915_v25, %v3126_v32  ;;  %v1594_v15 = vpop.f32.mrb[11].mxu0 }
 0x38a   : > { %v1654_v39 = vadd.f32 %v2315_v16, %v1592_v12  ;;  %v1595_v4 = vadd.f32 %v3126_v32, %v1594_v15 }
 0x38b   : > { %v1672_v20 = vmax.f32 %v1656_v7, 0.0  ;;  %v1657_v9 = vadd.f32 %v2316_v35, %v1603_v30  ;;  %v2327_v7 = vld [vmem:[%s2592_s15 + $0x60] sm:$0xff]  ;;  %v2329_v35 = vld [vmem:[%s2592_s15 + $0x68] sm:$0xff] }
 0x38c   : > { %v1670_v41 = vmax.f32 %v1654_v39, 0.0  ;;  %v1655_v28 = vadd.f32 %v2317_v42, %v1595_v4  ;;  %v2328_v39 = vld [vmem:[%s2592_s15 + $0x78] sm:$0xff]  ;;  %s2360_s15 = scalar_lea.vmem %s3199_s22, 2048 }
 0x38d   : > { %1688 = vst.msk [vmem:[%s3138_s20 + $0x10] sm:$0xff] %vm340_vm0, %v1672_v20  ;;  %v1673_v43 = vmax.f32 %v1657_v9, 0.0  ;;  %p2361_p6 = scmp.ne.s32.totalorder %s3199_s22, %s2360_s15  ;;  %p2368_p10 = scmp.lt.s32.totalorder %s2366_s8, %s2360_s15 }
 0x38e   : > { %1686 = vst.msk [vmem:[%s3138_s20] sm:$0xff] %vm340_vm0, %v1670_v41  ;;  %v1671_v50 = vmax.f32 %v1655_v28, 0.0 }
 0x38f   : > { %1689 = vst.msk [vmem:[%s3138_s20 + $0x18] sm:$0xff] %vm340_vm0, %v1673_v43  ;;  %p2362_p12 = pnand %p2361_p6, %p3264_p11  ;;  %p2369_p0 = por %p2368_p10, %p2367_p8 }
 0x390   : > { %1687 = vst.msk [vmem:[%s3138_s20 + $0x8] sm:$0xff] %vm340_vm0, %v1671_v50 }
 0x391   : > { %p2363_p13 = pneg %p2362_p12 }
 0x393   : > { %p2370_p2 = pnand %p2369_p0, %p2363_p13 }
 0x3b3   : > { %v1918_v21 = vpop.f32.mrb[12].mxu0 }
 0x3b4   : > { %v1616_v57 = vadd.f32 %v1918_v21, %v3126_v32  ;;  %v1607_v44 = vpop.f32.mrb[13].mxu0 }
 0x3b5   : > { %v1608_v40 = vadd.f32 %v3126_v32, %v1607_v44  ;;  %v1919_v24 = vpop.f32.mrb[14].mxu0 }
 0x3b6   : > { %v1660_v45 = vadd.f32 %v2318_v47, %v1616_v57  ;;  %v1619_v46 = vadd.f32 %v1919_v24, %v3126_v32  ;;  %v1610_v48 = vpop.f32.mrb[15].mxu0 }
 0x3b7   : > { %v1658_v11 = vadd.f32 %v2319_v49, %v1608_v40  ;;  %v1611_v26 = vadd.f32 %v3126_v32, %v1610_v48 }
 0x3b8   : > { %v1676_v27 = vmax.f32 %v1660_v45, 0.0  ;;  %v1661_v18 = vadd.f32 %v2320_v19, %v1619_v46 }
 0x3b9   : > { %v1674_v55 = vmax.f32 %v1658_v11, 0.0  ;;  %v1659_v14 = vadd.f32 %v2321_v56, %v1611_v26 }
 0x3ba   : > { %1692 = vst.msk [vmem:[%s3138_s20 + $0x30] sm:$0xff] %vm340_vm0, %v1676_v27  ;;  %v1677_v58 = vmax.f32 %v1661_v18, 0.0 }
 0x3bb   : > { %1690 = vst.msk [vmem:[%s3138_s20 + $0x20] sm:$0xff] %vm340_vm0, %v1674_v55  ;;  %v1675_v36 = vmax.f32 %v1659_v14, 0.0  ;;  %v1922_v5 = vpop.f32.mrb[16].mxu0 }
 0x3bc   : > { %1693 = vst.msk [vmem:[%s3138_s20 + $0x38] sm:$0xff] %vm340_vm0, %v1677_v58  ;;  %v1632_v51 = vadd.f32 %v1922_v5, %v3126_v32  ;;  %v1623_v29 = vpop.f32.mrb[17].mxu0 }
 0x3bd   : > { %1691 = vst.msk [vmem:[%s3138_s20 + $0x28] sm:$0xff] %vm340_vm0, %v1675_v36  ;;  %v1624_v60 = vadd.f32 %v3126_v32, %v1623_v29  ;;  %v1923_v38 = vpop.f32.mrb[18].mxu0 }
 0x3be   : > { %v1664_v33 = vadd.f32 %v2322_v31, %v1632_v51  ;;  %v1635_v61 = vadd.f32 %v1923_v38, %v3126_v32  ;;  %v1626_v53 = vpop.f32.mrb[19].mxu0 }
 0x3bf   : > { %v1662_v59 = vadd.f32 %v2323_v62, %v1624_v60  ;;  %v1627_v17 = vadd.f32 %v3126_v32, %v1626_v53 }
 0x3c0   : > { %v1680_v22 = vmax.f32 %v1664_v33, 0.0  ;;  %v1665_v34 = vadd.f32 %v2324_v52, %v1635_v61 }
 0x3c1   : > { %v1678_v23 = vmax.f32 %v1662_v59, 0.0  ;;  %v1663_v0 = vadd.f32 %v2325_v63, %v1627_v17 }
 0x3c2   : > { %1696 = vst.msk [vmem:[%s3138_s20 + $0x50] sm:$0xff] %vm340_vm0, %v1680_v22  ;;  %v1681_v1 = vmax.f32 %v1665_v34, 0.0 }
 0x3c3   : > { %1694 = vst.msk [vmem:[%s3138_s20 + $0x40] sm:$0xff] %vm340_vm0, %v1678_v23  ;;  %v1679_v2 = vmax.f32 %v1663_v0, 0.0 }
 0x3c4   : > { %1697 = vst.msk [vmem:[%s3138_s20 + $0x58] sm:$0xff] %vm340_vm0, %v1681_v1 }
 0x3c5   : > { %1695 = vst.msk [vmem:[%s3138_s20 + $0x48] sm:$0xff] %vm340_vm0, %v1679_v2 }
 0x3c7   : > { %v1926_v37 = vpop.f32.mrb[20].mxu0 }
 0x3c8   : > { %v1648_v3 = vadd.f32 %v1926_v37, %v3126_v32  ;;  %v1639_v6 = vpop.f32.mrb[21].mxu0 }
 0x3c9   : > { %v1640_v8 = vadd.f32 %v3126_v32, %v1639_v6  ;;  %v1927_v54 = vpop.f32.mrb[22].mxu0 }
 0x3ca   : > { %v1668_v12 = vadd.f32 %v2326_v10, %v1648_v3  ;;  %v1651_v25 = vadd.f32 %v1927_v54, %v3126_v32  ;;  %v1642_v13 = vpop.f32.mrb[23].mxu0 }
 0x3cb   : > { %v1666_v30 = vadd.f32 %v2327_v7, %v1640_v8  ;;  %v1643_v15 = vadd.f32 %v3126_v32, %v1642_v13 }
 0x3cc   : > { %v1684_v16 = vmax.f32 %v1668_v12, 0.0  ;;  %v1669_v4 = vadd.f32 %v2328_v39, %v1651_v25 }
 0x3cd   : > { %v1682_v20 = vmax.f32 %v1666_v30, 0.0  ;;  %v1667_v9 = vadd.f32 %v2329_v35, %v1643_v15 }
 0x3ce   : > { %1700 = vst.msk [vmem:[%s3138_s20 + $0x70] sm:$0xff] %vm340_vm0, %v1684_v16  ;;  %v1685_v41 = vmax.f32 %v1669_v4, 0.0 }
 0x3cf   : > { %1698 = vst.msk [vmem:[%s3138_s20 + $0x60] sm:$0xff] %vm340_vm0, %v1682_v20  ;;  %v1683_v32 = vmax.f32 %v1667_v9, 0.0 }
 0x3d0   : > { %1701 = vst.msk [vmem:[%s3138_s20 + $0x78] sm:$0xff] %vm340_vm0, %v1685_v41 }
 0x3d1   : > { %1699 = vst.msk [vmem:[%s3138_s20 + $0x68] sm:$0xff] %vm340_vm0, %v1683_v32 }
 0x3d2   : > { %2373 = shalt.err (!%p2370_p2)
}
 0x3d3   : > { %s2374_s11 = scalar_lea.hbm %s3195_s19, 2048  ;;  %s2378_s23 = scalar_lea.hbm %s3255_s7, 4096 }
 0x3d4   : > { %p2375_p4 = scmp.ne.s32.totalorder %s3195_s19, %s2374_s11  ;;  %p2379_p9 = scmp.lt.u32.totalorder %s3195_s19, %s3255_s7 }
 0x3d5   : > { %p2380_p1 = scmp.lt.u32.totalorder %s2378_s23, %s2374_s11  ;;  %p2382_p6 = scmp.lt.u32.totalorder %s2374_s11, %s3195_s19 }
 0x3d6   : > { %p2376_p5 = pnand %p2375_p4, %p3264_p11 }
 0x3d7   : > { %p2381_p3 = por %p2380_p1, %p2379_p9 }
 0x3d8   : > { %p2377_p7 = pneg %p2376_p5 }
 0x3d9   : > { %p2383_p12 = por %p2382_p6, %p2381_p3 }
 0x3db   : > { %p2384_p13 = pnand %p2383_p12, %p2377_p7 }
 0x3dd   : > { %2387 = shalt.err (!%p2384_p13)
}
 0x3de   : > { %s2441_s15 = smov 128  }
 0x3df   : > { %1934 = dma.vmem_to_hbm [thread:$0]  (%p3264_p11), %s3199_s22, 2048, %s3195_s19, %s1703_s28, %s2441_s15, %s2441_s15, %s2432_s29  }
 0x3e0 PF: > { %s1732_s21 = sand.u32 1, %s2414_s24   ;;  %p3265_p8 = scmp.ne.s32.totalorder %s3261_s14, 0 }
 0x3e1   : > { %p3266_p10 = scmp.ge.s32.totalorder %s2426_s27, 2  ;;  %s1733_s9 = scalar_lea.sflag [#allocation5], %s1732_s21 }
 0x3e3   : > { %p1941_p0 = pnand %p3266_p10, %p3265_p8 }
 0x3e5   : > { %2409 = dma.done.wait (!%p1941_p0), %s1733_s9, 2048  }
 0x3e6   : > { %2411 = vsyncadd (!%p1941_p0), %s1733_s9, 4294965248  ;;  %p20_p2 = scmp.ge.s32.totalorder %s2507_s30, 4   ;;  %s3267_s24 = smov %s2418_s25 }
 0x3e7   : > { %s3268_s25 = smov %s2422_s26  ;;  %s3269_s26 = smov %s2519_s10 }
 0x3e8   : > { %s3270_s27 = smov %s2507_s30  ;;  %22 = sbr.rel (!%p20_p2) target bundleno = 5 (0x5), region = 96 }
 0x3ef   :  { %1738 = vsyncpa [#allocation4], 1 }
 0x3f0   :  { %1740 = vsyncpa [#allocation4 + $0x1], 1 }
 0x3f1   :  { %1741 = vsyncpa [#allocation5], 1 }
 0x3f2   :  { %1743 = vsyncpa [#allocation5 + $0x1], 1 }

</bundles_post_ra>
